<compile_context>
chip_gen: v7x
topology: tpu7x:2x2x1
jax: 0.10.0
libtpu: 0.0.40
codegen_flags: <defaults>
</compile_context>

<pallas_src>
import functools

import numpy as np
import jax
import jax.numpy as jnp
from jax.experimental import pallas as pl
from jax.experimental.pallas import tpu as pltpu

V_THRESHOLD = 1.0
V_RESET = 0.0
BN_EPS = 1e-5


# --------------------------- Pallas: conv1 (+ folded BN) as one matmul -------

def _matmul_bias_kernel(a_ref, b_ref, bias_ref, o_ref):
    acc = jnp.dot(a_ref[...], b_ref[...], preferred_element_type=jnp.float32)
    o_ref[...] = acc + bias_ref[...]


def matmul_bias(a, b, bias):
    """(M, K) @ (K, N) + bias[N] -> (M, N) float32 on the MXU."""
    M, K = a.shape
    _, N = b.shape
    tm = M
    for cand in (512, 256, 128, 64, 32, 16, 8):   # largest divisor keeps pipelining
        if M % cand == 0:
            tm = cand
            break
    return pl.pallas_call(
        _matmul_bias_kernel,
        out_shape=jax.ShapeDtypeStruct((M, N), jnp.float32),
        grid=(M // tm,),
        in_specs=[
            pl.BlockSpec((tm, K), lambda i: (i, 0)),
            pl.BlockSpec((K, N), lambda i: (0, 0)),
            pl.BlockSpec((1, N), lambda i: (0, 0)),
        ],
        out_specs=pl.BlockSpec((tm, N), lambda i: (i, 0)),
        compiler_params=pltpu.CompilerParams(dimension_semantics=("parallel",)),
    )(a, b, bias.reshape(1, N))


# --------------------------- Pallas: fused per-timestep SNN kernel -----------

def _snn_fused_kernel(s16_ref, b2_ref, w2c_ref, wfc_ref,
                      counter_ref, x2_ref,
                      v1_ref, v2_ref, v3_ref,
                      *, nb, dim2, c2, nq):
    t = pl.program_id(0)

    # Membrane potentials / spike counter persist across the T grid steps.
    @pl.when(t == 0)
    def _init():
        v1_ref[...] = jnp.zeros_like(v1_ref)
        v2_ref[...] = jnp.zeros_like(v2_ref)
        v3_ref[...] = jnp.zeros_like(v3_ref)
        counter_ref[...] = jnp.zeros_like(counter_ref)

    # ---- IFNode 1: charge, fire (h >= v_th), hard reset to v_reset.
    # s16/v1 hold the 16 spatial-residue (mod 4) partitions of the static conv
    # output as (16, hp*nb, hp*c1) matrices with rows=(u, n), cols=(v, c).
    h1 = v1_ref[...] + s16_ref[...]
    fire1 = h1 >= V_THRESHOLD
    sp1 = fire1.astype(jnp.float32)
    v1_ref[...] = jnp.where(fire1, V_RESET, h1)

    # ---- MaxPool2d(2,2) #1: each pooled residue-(r,s) matrix is the
    # elementwise max of 4 of the 16 spike partitions.
    pooled = []
    for r in range(2):
        for sx in range(2):
            m0 = jnp.maximum(sp1[(2 * r) * 4 + 2 * sx],
                             sp1[(2 * r) * 4 + 2 * sx + 1])
            m1 = jnp.maximum(sp1[(2 * r + 1) * 4 + 2 * sx],
                             sp1[(2 * r + 1) * 4 + 2 * sx + 1])
            pooled.append(jnp.maximum(m0, m1))

    # ---- Conv2d + folded BN2 as 4*nq small MXU matmuls against
    # block-Toeplitz-expanded weights.  Output z2: rows=(a, n),
    # cols=((dy, dx), b, oc) so the next pool is a max over column blocks.
    acc = None
    for r in range(2):
        for sx in range(2):
            p_rs = pooled[r * 2 + sx]
            for q in range(nq):
                lhs = p_rs[q * nb:(q + dim2) * nb, :]
                part = jnp.dot(lhs, w2c_ref[(r * 2 + sx) * nq + q],
                               preferred_element_type=jnp.float32)
                acc = part if acc is None else acc + part
    z2 = acc + b2_ref[...]

    # ---- IFNode 2
    h2 = v2_ref[...] + z2
    fire2 = h2 >= V_THRESHOLD
    sp2 = fire2.astype(jnp.float32)
    v2_ref[...] = jnp.where(fire2, V_RESET, h2)

    # ---- MaxPool2d(2,2) #2: max over the four (dy, dx) column blocks.
    wblk = dim2 * c2
    p2 = jnp.maximum(
        jnp.maximum(sp2[:, 0:wblk], sp2[:, wblk:2 * wblk]),
        jnp.maximum(sp2[:, 2 * wblk:3 * wblk], sp2[:, 3 * wblk:4 * wblk]))
    x2_ref[0] = p2                     # per-step x2 block, rows=(a,n), cols=(b,oc)

    # ---- fc: Flatten -> Dropout (eval: identity) -> Linear(no bias) -> IFNode
    # TODO(synk): spikingjelly training-mode Dropout (mask shared across T) not implemented.
    z3 = None
    for a in range(dim2):
        za = jnp.dot(p2[a * nb:(a + 1) * nb, :], wfc_ref[a],
                     preferred_element_type=jnp.float32)
        z3 = za if z3 is None else z3 + za
    h3 = v3_ref[...] + z3
    fire3 = h3 >= V_THRESHOLD
    v3_ref[...] = jnp.where(fire3, V_RESET, h3)
    counter_ref[...] = counter_ref[...] + fire3.astype(jnp.float32)


# --------------------------- JAX glue (runs once, time-invariant) ------------

def im2col(x_nchw, kh, kw):
    """NCHW 'valid' conv patches -> (N*OH*OW, C*KH*KW), rows in (n, y, x) order,
    columns in (IC, KH, KW) order (matches the PyTorch conv weight layout)."""
    n, c, h, w = x_nchw.shape
    oh, ow = h - kh + 1, w - kw + 1
    cols = []
    for dy in range(kh):
        for dx in range(kw):
            cols.append(x_nchw[:, :, dy:dy + oh, dx:dx + ow])
    p = jnp.stack(cols, axis=2)                       # (n, c, kh*kw, oh, ow)
    p = p.reshape(n, c * kh * kw, oh, ow)
    return p.transpose(0, 2, 3, 1).reshape(n * oh * ow, c * kh * kw), oh, ow


def fold_conv_bn(w, gamma, beta, mean, var):
    """Fold eval-mode BatchNorm into a bias-free conv; returns ((K, OC), bias)."""
    scale = gamma / jnp.sqrt(var + BN_EPS)
    oc = w.shape[0]
    w2 = (w * scale.reshape(oc, 1, 1, 1)).reshape(oc, -1).T
    bias = beta - mean * scale
    return w2.astype(jnp.float32), bias.astype(jnp.float32)


def _partition_static(s_rows, *, nb, oh1, ow1, c1):
    """(nb*oh1*ow1, c1) static conv output (rows in (n, y, x) order) ->
    16 residue-mod-4 partitions as (16, (oh1//4)*nb, (ow1//4)*c1):
    s16[ry*4+rx][u*nb+n, v*c1+c] == s[n, 4u+ry, 4v+rx, c]."""
    hy, hx = oh1 // 4, ow1 // 4
    img = s_rows.reshape(nb, hy, 4, hx, 4, c1)         # (n, u, ry, v, rx, c)
    img = img.transpose(2, 4, 1, 0, 3, 5)              # (ry, rx, u, n, v, c)
    return img.reshape(16, hy * nb, hx * c1)


def _conv2_combined_weights(w_conv, gamma, beta, mean, var, *, hp, dim2, k2):
    """Fold BN2 into conv2 and expand into the 4*nq block-Toeplitz matmul
    operands used by the fused kernel (time-invariant, built once)."""
    c2, c1 = w_conv.shape[0], w_conv.shape[1]
    scale = gamma / jnp.sqrt(var + BN_EPS)
    w2f = (w_conv * scale[:, None, None, None]).transpose(2, 3, 1, 0)  # (ky,kx,ic,oc)
    b2f = (beta - mean * scale).astype(jnp.float32)
    nq = k2 // 2 + 1

    # Static 0/1 selection tensor (numpy; independent of traced values):
    # sel[r, s, q, v, dy, dx, b, ky, kx] == 1 iff conv tap (ky, kx) links
    # pooled residue (r, s), row slice q, column v to output (dy, dx), column b.
    sel = np.zeros((2, 2, nq, hp, 2, 2, dim2, k2, k2), np.float32)
    for r in range(2):
        for s in range(2):
            for q in range(nq):
                for dy in range(2):
                    ky = 2 * q + r - dy
                    if not 0 <= ky < k2:
                        continue
                    for dx in range(2):
                        for b in range(dim2):
                            for v in range(hp):
                                kx = 2 * (v - b) + s - dx
                                if 0 <= kx < k2:
                                    sel[r, s, q, v, dy, dx, b, ky, kx] = 1.0
    sel = jnp.asarray(sel.reshape(4 * nq, hp, 2, 2, dim2, k2, k2))
    w2c = jnp.einsum('mvyxbjk,jkco->mvcyxbo', sel, w2f.astype(jnp.float32))
    w2c = w2c.reshape(4 * nq, hp * c1, 4 * dim2 * c2)
    b2t = jnp.tile(b2f, 4 * dim2).reshape(1, 4 * dim2 * c2)
    return w2c, b2t


def _fc_weights(fc_w, *, c2, dim2):
    """PyTorch flatten order of (N, c2, dim2, dim2) is (oc, a, b); our pooled
    activation is rows=(a, n), cols=(b, oc) -> one (64, 10) weight per a."""
    f = fc_w.reshape(10, c2, dim2, dim2)               # [k, oc, a, b]
    return f.transpose(2, 3, 1, 0).reshape(dim2, dim2 * c2, 10).astype(jnp.float32)


# --------------------------- forward ------------------------------------------

def snn_forward(x, params, *, T, nf, ks):
    nb, in_c, H, W = x.shape
    c1, c2 = nf
    k1, k2 = ks
    assert H == 28 and W == 28, "module hardcodes a 28x28 input"

    # static_conv: Conv2d(in_c, c1, k1, bias=False) + BatchNorm2d (runs once)
    w1, b1 = fold_conv_bn(params['conv1_w'], params['bn1_g'], params['bn1_b'],
                          params['bn1_m'], params['bn1_v'])
    patches1, oh1, ow1 = im2col(x, k1, k1)
    s_static = matmul_bias(patches1, w1, b1)           # (nb*oh1*ow1, c1)

    dim1 = oh1 // 2
    oh2 = dim1 - k2 + 1
    dim2 = oh2 // 2
    hp = dim1 // 2
    nq = k2 // 2 + 1
    assert oh1 == ow1 and oh1 % 4 == 0 and oh2 % 2 == 0

    # Time-invariant operands for the fused per-timestep kernel (built once).
    s16 = _partition_static(s_static, nb=nb, oh1=oh1, ow1=ow1, c1=c1)
    w2c, b2t = _conv2_combined_weights(params['conv2_w'], params['bn2_g'],
                                       params['bn2_b'], params['bn2_m'],
                                       params['bn2_v'], hp=hp, dim2=dim2, k2=k2)
    wfc = _fc_weights(params['fc_w'], c2=c2, dim2=dim2)

    ncol2 = 4 * dim2 * c2
    kernel = functools.partial(_snn_fused_kernel, nb=nb, dim2=dim2, c2=c2, nq=nq)

    counter, x2_raw = pl.pallas_call(
        kernel,
        out_shape=(jax.ShapeDtypeStruct((nb, 10), jnp.float32),
                   jax.ShapeDtypeStruct((T, dim2 * nb, dim2 * c2), jnp.float32)),
        grid=(T,),
        in_specs=[
            pl.BlockSpec((16, hp * nb, hp * c1), lambda t: (0, 0, 0)),   # s16
            pl.BlockSpec((1, ncol2), lambda t: (0, 0)),                  # folded BN2 bias
            pl.BlockSpec((4 * nq, hp * c1, ncol2), lambda t: (0, 0, 0)), # conv2 weights
            pl.BlockSpec((dim2, dim2 * c2, 10), lambda t: (0, 0, 0)),    # fc weights
        ],
        out_specs=(
            pl.BlockSpec((nb, 10), lambda t: (0, 0)),                    # spike counter
            pl.BlockSpec((1, dim2 * nb, dim2 * c2), lambda t: (t, 0, 0)),  # x2[t]
        ),
        scratch_shapes=[
            pltpu.VMEM((16, hp * nb, hp * c1), jnp.float32),   # v1
            pltpu.VMEM((dim2 * nb, ncol2), jnp.float32),       # v2
            pltpu.VMEM((nb, 10), jnp.float32),                 # v3
        ],
        compiler_params=pltpu.CompilerParams(dimension_semantics=("arbitrary",)),
    )(s16, b2t, w2c, wfc)

    # x2_raw rows = (a, n), cols = (b, oc)  ->  (T, N, c2, dim2, dim2) NCHW
    x2 = x2_raw.reshape(T, dim2, nb, dim2, c2).transpose(0, 2, 4, 1, 3)
    # use_softmax=False default path
    return counter / T, x2


# --------------------------- plain-JAX reference (sanity check only) ---------

def _reference_forward(x, params, *, T, nf, ks):
    nb = x.shape[0]
    c1, c2 = nf
    k1, k2 = ks

    def bn_fold(g, b, m, v):
        s = g / jnp.sqrt(v + BN_EPS)
        return s, b - m * s

    def if_step(v, cur):
        h = v + cur
        spike = (h >= V_THRESHOLD).astype(jnp.float32)
        return jnp.where(h >= V_THRESHOLD, V_RESET, h), spike

    def pool2x2(y):  # NCHW
        n, c, hh, ww = y.shape
        return y.reshape(n, c, hh // 2, 2, ww // 2, 2).max(axis=(3, 5))

    def conv(y, w):  # NCHW valid conv
        return jax.lax.conv_general_dilated(
            y, w, (1, 1), 'VALID', dimension_numbers=('NCHW', 'OIHW', 'NCHW'))

    s1, t1 = bn_fold(params['bn1_g'], params['bn1_b'], params['bn1_m'], params['bn1_v'])
    s2, t2 = bn_fold(params['bn2_g'], params['bn2_b'], params['bn2_m'], params['bn2_v'])
    stat = conv(x, params['conv1_w']) * s1[None, :, None, None] + t1[None, :, None, None]
    oh1 = stat.shape[2]
    oh2 = oh1 // 2 - k2 + 1
    dim2 = oh2 // 2

    v1 = jnp.zeros_like(stat)
    v2 = jnp.zeros((nb, c2, oh2, oh2), jnp.float32)
    v3 = jnp.zeros((nb, 10), jnp.float32)
    counter = jnp.zeros((nb, 10), jnp.float32)
    x2_steps = []
    for _ in range(T):
        v1, sp1 = if_step(v1, stat)
        p1 = pool2x2(sp1)
        z2 = conv(p1, params['conv2_w']) * s2[None, :, None, None] + t2[None, :, None, None]
        v2, sp2 = if_step(v2, z2)
        p2 = pool2x2(sp2)
        x2_steps.append(p2)
        z3 = p2.reshape(nb, c2 * dim2 * dim2) @ params['fc_w'].T
        v3, sp3 = if_step(v3, z3)
        counter = counter + sp3
    return counter / T, jnp.stack(x2_steps, axis=0)


# --------------------------- params / demo -------------------------------------

def init_params(key, in_c, nf, ks, dim2):
    c1, c2 = nf
    k1, k2 = ks
    keys = jax.random.split(key, 7)
    return dict(
        conv1_w=0.2 * jax.random.normal(keys[0], (c1, in_c, k1, k1), jnp.float32),
        bn1_g=1.0 + 0.1 * jax.random.normal(keys[1], (c1,), jnp.float32),
        bn1_b=0.1 * jax.random.normal(keys[2], (c1,), jnp.float32),
        bn1_m=jnp.zeros((c1,), jnp.float32),
        bn1_v=jnp.ones((c1,), jnp.float32),
        conv2_w=0.1 * jax.random.normal(keys[3], (c2, c1, k2, k2), jnp.float32),
        bn2_g=1.0 + 0.1 * jax.random.normal(keys[4], (c2,), jnp.float32),
        bn2_b=0.1 * jax.random.normal(keys[5], (c2,), jnp.float32),
        bn2_m=jnp.zeros((c2,), jnp.float32),
        bn2_v=jnp.ones((c2,), jnp.float32),
        fc_w=0.1 * jax.random.normal(keys[6], (10, c2 * dim2 * dim2), jnp.float32),
    )


if __name__ == "__main__":
    # small, module-consistent config (spatial must be 28x28 per the module's
    # hardcoded dim1 formula)
    in_c = 1
    nf = (8, 16)
    ks = (5, 5)
    T = 4
    batch = 2
    dim1 = (28 - ks[0] + 1) // 2
    dim2 = (dim1 - ks[1] + 1) // 2

    key = jax.random.PRNGKey(0)
    kx, kp = jax.random.split(key)
    x = jax.random.normal(kx, (batch, in_c, 28, 28), jnp.float32)
    params = init_params(kp, in_c, nf, ks, dim2)

    fwd = jax.jit(functools.partial(snn_forward, T=T, nf=nf, ks=ks))
    out, x2 = fwd(x, params)
    jax.block_until_ready((out, x2))

    assert out.shape == (batch, 10)
    assert x2.shape == (T, batch, nf[1], dim2, dim2)

    # Sanity check against a plain-JAX reference of the same forward pass.
    # Thresholds are loose so a rare f32 threshold-boundary spike flip (from
    # differing accumulation order) cannot trip them, while any real indexing
    # bug would blow far past them.
    ref_out, ref_x2 = _reference_forward(x, params, T=T, nf=nf, ks=ks)
    assert float(jnp.mean(jnp.abs(out - ref_out))) < 0.1
    assert float(jnp.mean(jnp.abs(x2 - ref_x2))) < 0.05

    print("KERNEL_OK")
</pallas_src>

<mosaic_0001>
module attributes {stable_mosaic.version = 11 : i64} {
  func.func @_matmul_bias_kernel(%arg0: i32, %arg1: memref<128x25xf32, #tpu.memory_space<vmem>>, %arg2: memref<25x8xf32, #tpu.memory_space<vmem>>, %arg3: memref<1x8xf32, #tpu.memory_space<vmem>>, %arg4: memref<128x8xf32, #tpu.memory_space<vmem>>) attributes {dimension_semantics = [#tpu.dimension_semantics<parallel>], iteration_bounds = array<i64: 9>, scalar_prefetch = 0 : i64, scratch_operands = 0 : i64, tpu.core_type = #tpu.core_type<tc>, window_params = [{transform_indices = @transform_0, window_bounds = array<i64: 128, 25>}, {pipeline_mode = #tpu.pipeline_mode<synchronous>, transform_indices = @transform_1, window_bounds = array<i64: 25, 8>}, {pipeline_mode = #tpu.pipeline_mode<synchronous>, transform_indices = @transform_2, window_bounds = array<i64: 1, 8>}, {transform_indices = @transform_3, window_bounds = array<i64: 128, 8>}]} {
    %c0 = arith.constant 0 : index
    %c0_0 = arith.constant 0 : index
    %0 = vector.load %arg1[%c0, %c0_0] : memref<128x25xf32, #tpu.memory_space<vmem>>, vector<128x25xf32>
    %c0_1 = arith.constant 0 : index
    %c0_2 = arith.constant 0 : index
    %1 = vector.load %arg2[%c0_1, %c0_2] : memref<25x8xf32, #tpu.memory_space<vmem>>, vector<25x8xf32>
    %cst = arith.constant dense<0.000000e+00> : vector<128x8xf32>
    %2 = tpu.matmul %0, %1, %cst {dimension_numbers = #tpu.dot_dimension_numbers<[1], [0], [0], [1], [0, 0, 1, 1], [], []>} : vector<128x25xf32>, vector<25x8xf32>, vector<128x8xf32> -> vector<128x8xf32>
    %c0_3 = arith.constant 0 : index
    %c0_4 = arith.constant 0 : index
    %3 = vector.load %arg3[%c0_3, %c0_4] : memref<1x8xf32, #tpu.memory_space<vmem>>, vector<1x8xf32>
    %4 = vector.broadcast %3 : vector<1x8xf32> to vector<128x8xf32>
    %5 = arith.addf %2, %4 : vector<128x8xf32>
    %c0_5 = arith.constant 0 : index
    %c0_6 = arith.constant 0 : index
    %6 = vector.load %arg4[%c0_5, %c0_6] : memref<128x8xf32, #tpu.memory_space<vmem>>, vector<128x8xf32>
    tpu.vector_store %arg4[%c0_5, %c0_6], %5 {strides = array<i32>} : memref<128x8xf32, #tpu.memory_space<vmem>>, vector<128x8xf32>,
    return
  }
  func.func @transform_0(%arg0: i32) -> (i32, i32) {
    %c0_i32 = arith.constant 0 : i32
    %c0_i32_0 = arith.constant 0 : i32
    return %arg0, %c0_i32 : i32, i32
  }
  func.func @transform_1(%arg0: i32) -> (i32, i32) {
    %c0_i32 = arith.constant 0 : i32
    %c0_i32_0 = arith.constant 0 : i32
    %c0_i32_1 = arith.constant 0 : i32
    return %c0_i32, %c0_i32_0 : i32, i32
  }
  func.func @transform_2(%arg0: i32) -> (i32, i32) {
    %c0_i32 = arith.constant 0 : i32
    %c0_i32_0 = arith.constant 0 : i32
    %c0_i32_1 = arith.constant 0 : i32
    return %c0_i32, %c0_i32_0 : i32, i32
  }
  func.func @transform_3(%arg0: i32) -> (i32, i32) {
    %c0_i32 = arith.constant 0 : i32
    %c0_i32_0 = arith.constant 0 : i32
    return %arg0, %c0_i32 : i32, i32
  }
}

module attributes {stable_mosaic.version = 11 : i64} {
  func.func @_snn_fused_kernel(%arg0: i32, %arg1: memref<16x12x48xf32, #tpu.memory_space<vmem>>, %arg2: memref<1x256xf32, #tpu.memory_space<vmem>>, %arg3: memref<12x48x256xf32, #tpu.memory_space<vmem>>, %arg4: memref<4x64x10xf32, #tpu.memory_space<vmem>>, %arg5: memref<2x10xf32, #tpu.memory_space<vmem>>, %arg6: memref<1x8x64xf32, #tpu.memory_space<vmem>>, %arg7: memref<16x12x48xf32, #tpu.memory_space<vmem>>, %arg8: memref<8x256xf32, #tpu.memory_space<vmem>>, %arg9: memref<2x10xf32, #tpu.memory_space<vmem>>) attributes {dimension_semantics = [#tpu.dimension_semantics<arbitrary>], iteration_bounds = array<i64: 4>, scalar_prefetch = 0 : i64, scratch_operands = 3 : i64, tpu.core_type = #tpu.core_type<tc>, window_params = [{pipeline_mode = #tpu.pipeline_mode<synchronous>, transform_indices = @transform_0, window_bounds = array<i64: 16, 12, 48>}, {pipeline_mode = #tpu.pipeline_mode<synchronous>, transform_indices = @transform_1, window_bounds = array<i64: 1, 256>}, {pipeline_mode = #tpu.pipeline_mode<synchronous>, transform_indices = @transform_2, window_bounds = array<i64: 12, 48, 256>}, {pipeline_mode = #tpu.pipeline_mode<synchronous>, transform_indices = @transform_3, window_bounds = array<i64: 4, 64, 10>}, {pipeline_mode = #tpu.pipeline_mode<synchronous>, transform_indices = @transform_4, window_bounds = array<i64: 2, 10>}, {transform_indices = @transform_5, window_bounds = array<i64: 1, 8, 64>}]} {
    %c0_i32 = arith.constant 0 : i32
    %0 = arith.cmpi eq, %arg0, %c0_i32 : i32
    %1 = arith.extui %0 : i1 to i32
    %c0_i32_0 = arith.constant 0 : i32
    %2 = arith.cmpi ne, %1, %c0_i32_0 : i32
    scf.if %2 {
      %cst_84 = arith.constant 0.000000e+00 : f32
      %169 = vector.broadcast %cst_84 : f32 to vector<16x12x48xf32>
      %c0_85 = arith.constant 0 : index
      %c0_86 = arith.constant 0 : index
      %c0_87 = arith.constant 0 : index
      %170 = vector.load %arg7[%c0_85, %c0_86, %c0_87] : memref<16x12x48xf32, #tpu.memory_space<vmem>>, vector<16x12x48xf32>
      tpu.vector_store %arg7[%c0_85, %c0_86, %c0_87], %169 {strides = array<i32>} : memref<16x12x48xf32, #tpu.memory_space<vmem>>, vector<16x12x48xf32>,
      %cst_88 = arith.constant 0.000000e+00 : f32
      %171 = vector.broadcast %cst_88 : f32 to vector<8x256xf32>
      %c0_89 = arith.constant 0 : index
      %c0_90 = arith.constant 0 : index
      %172 = vector.load %arg8[%c0_89, %c0_90] : memref<8x256xf32, #tpu.memory_space<vmem>>, vector<8x256xf32>
      tpu.vector_store %arg8[%c0_89, %c0_90], %171 {strides = array<i32>} : memref<8x256xf32, #tpu.memory_space<vmem>>, vector<8x256xf32>,
      %cst_91 = arith.constant 0.000000e+00 : f32
      %173 = vector.broadcast %cst_91 : f32 to vector<2x10xf32>
      %c0_92 = arith.constant 0 : index
      %c0_93 = arith.constant 0 : index
      %174 = vector.load %arg9[%c0_92, %c0_93] : memref<2x10xf32, #tpu.memory_space<vmem>>, vector<2x10xf32>
      tpu.vector_store %arg9[%c0_92, %c0_93], %173 {strides = array<i32>} : memref<2x10xf32, #tpu.memory_space<vmem>>, vector<2x10xf32>,
      %cst_94 = arith.constant 0.000000e+00 : f32
      %175 = vector.broadcast %cst_94 : f32 to vector<2x10xf32>
      %c0_95 = arith.constant 0 : index
      %c0_96 = arith.constant 0 : index
      %176 = vector.load %arg5[%c0_95, %c0_96] : memref<2x10xf32, #tpu.memory_space<vmem>>, vector<2x10xf32>
      tpu.vector_store %arg5[%c0_95, %c0_96], %175 {strides = array<i32>} : memref<2x10xf32, #tpu.memory_space<vmem>>, vector<2x10xf32>,
    } else {
    }
    %c0 = arith.constant 0 : index
    %c0_1 = arith.constant 0 : index
    %c0_2 = arith.constant 0 : index
    %3 = vector.load %arg7[%c0, %c0_1, %c0_2] : memref<16x12x48xf32, #tpu.memory_space<vmem>>, vector<16x12x48xf32>
    %c0_3 = arith.constant 0 : index
    %c0_4 = arith.constant 0 : index
    %c0_5 = arith.constant 0 : index
    %4 = vector.load %arg1[%c0_3, %c0_4, %c0_5] : memref<16x12x48xf32, #tpu.memory_space<vmem>>, vector<16x12x48xf32>
    %5 = arith.addf %3, %4 : vector<16x12x48xf32>
    %cst = arith.constant 1.000000e+00 : f32
    %6 = vector.broadcast %cst : f32 to vector<16x12x48xf32>
    %7 = arith.cmpf oge, %5, %6 : vector<16x12x48xf32>
    %8 = arith.extui %7 : vector<16x12x48xi1> to vector<16x12x48xi32>
    %9 = arith.sitofp %8 : vector<16x12x48xi32> to vector<16x12x48xf32>
    %cst_6 = arith.constant 0.000000e+00 : f32
    %10 = vector.broadcast %cst_6 : f32 to vector<16x12x48xf32>
    %11 = arith.select %7, %10, %5 : vector<16x12x48xi1>, vector<16x12x48xf32>
    %c0_7 = arith.constant 0 : index
    %c0_8 = arith.constant 0 : index
    %c0_9 = arith.constant 0 : index
    %12 = vector.load %arg7[%c0_7, %c0_8, %c0_9] : memref<16x12x48xf32, #tpu.memory_space<vmem>>, vector<16x12x48xf32>
    tpu.vector_store %arg7[%c0_7, %c0_8, %c0_9], %11 {strides = array<i32>} : memref<16x12x48xf32, #tpu.memory_space<vmem>>, vector<16x12x48xf32>,
    %13 = vector.extract_strided_slice %9 {offsets = [0, 0, 0], sizes = [1, 12, 48], strides = [1, 1, 1]} : vector<16x12x48xf32> to vector<1x12x48xf32>
    %14 = vector.shape_cast %13 : vector<1x12x48xf32> to vector<12x48xf32>
    %15 = vector.extract_strided_slice %9 {offsets = [1, 0, 0], sizes = [1, 12, 48], strides = [1, 1, 1]} : vector<16x12x48xf32> to vector<1x12x48xf32>
    %16 = vector.shape_cast %15 : vector<1x12x48xf32> to vector<12x48xf32>
    %17 = arith.maximumf %14, %16 : vector<12x48xf32>
    %18 = vector.extract_strided_slice %9 {offsets = [4, 0, 0], sizes = [1, 12, 48], strides = [1, 1, 1]} : vector<16x12x48xf32> to vector<1x12x48xf32>
    %19 = vector.shape_cast %18 : vector<1x12x48xf32> to vector<12x48xf32>
    %20 = vector.extract_strided_slice %9 {offsets = [5, 0, 0], sizes = [1, 12, 48], strides = [1, 1, 1]} : vector<16x12x48xf32> to vector<1x12x48xf32>
    %21 = vector.shape_cast %20 : vector<1x12x48xf32> to vector<12x48xf32>
    %22 = arith.maximumf %19, %21 : vector<12x48xf32>
    %23 = arith.maximumf %17, %22 : vector<12x48xf32>
    %24 = vector.extract_strided_slice %9 {offsets = [2, 0, 0], sizes = [1, 12, 48], strides = [1, 1, 1]} : vector<16x12x48xf32> to vector<1x12x48xf32>
    %25 = vector.shape_cast %24 : vector<1x12x48xf32> to vector<12x48xf32>
    %26 = vector.extract_strided_slice %9 {offsets = [3, 0, 0], sizes = [1, 12, 48], strides = [1, 1, 1]} : vector<16x12x48xf32> to vector<1x12x48xf32>
    %27 = vector.shape_cast %26 : vector<1x12x48xf32> to vector<12x48xf32>
    %28 = arith.maximumf %25, %27 : vector<12x48xf32>
    %29 = vector.extract_strided_slice %9 {offsets = [6, 0, 0], sizes = [1, 12, 48], strides = [1, 1, 1]} : vector<16x12x48xf32> to vector<1x12x48xf32>
    %30 = vector.shape_cast %29 : vector<1x12x48xf32> to vector<12x48xf32>
    %31 = vector.extract_strided_slice %9 {offsets = [7, 0, 0], sizes = [1, 12, 48], strides = [1, 1, 1]} : vector<16x12x48xf32> to vector<1x12x48xf32>
    %32 = vector.shape_cast %31 : vector<1x12x48xf32> to vector<12x48xf32>
    %33 = arith.maximumf %30, %32 : vector<12x48xf32>
    %34 = arith.maximumf %28, %33 : vector<12x48xf32>
    %35 = vector.extract_strided_slice %9 {offsets = [8, 0, 0], sizes = [1, 12, 48], strides = [1, 1, 1]} : vector<16x12x48xf32> to vector<1x12x48xf32>
    %36 = vector.shape_cast %35 : vector<1x12x48xf32> to vector<12x48xf32>
    %37 = vector.extract_strided_slice %9 {offsets = [9, 0, 0], sizes = [1, 12, 48], strides = [1, 1, 1]} : vector<16x12x48xf32> to vector<1x12x48xf32>
    %38 = vector.shape_cast %37 : vector<1x12x48xf32> to vector<12x48xf32>
    %39 = arith.maximumf %36, %38 : vector<12x48xf32>
    %40 = vector.extract_strided_slice %9 {offsets = [12, 0, 0], sizes = [1, 12, 48], strides = [1, 1, 1]} : vector<16x12x48xf32> to vector<1x12x48xf32>
    %41 = vector.shape_cast %40 : vector<1x12x48xf32> to vector<12x48xf32>
    %42 = vector.extract_strided_slice %9 {offsets = [13, 0, 0], sizes = [1, 12, 48], strides = [1, 1, 1]} : vector<16x12x48xf32> to vector<1x12x48xf32>
    %43 = vector.shape_cast %42 : vector<1x12x48xf32> to vector<12x48xf32>
    %44 = arith.maximumf %41, %43 : vector<12x48xf32>
    %45 = arith.maximumf %39, %44 : vector<12x48xf32>
    %46 = vector.extract_strided_slice %9 {offsets = [10, 0, 0], sizes = [1, 12, 48], strides = [1, 1, 1]} : vector<16x12x48xf32> to vector<1x12x48xf32>
    %47 = vector.shape_cast %46 : vector<1x12x48xf32> to vector<12x48xf32>
    %48 = vector.extract_strided_slice %9 {offsets = [11, 0, 0], sizes = [1, 12, 48], strides = [1, 1, 1]} : vector<16x12x48xf32> to vector<1x12x48xf32>
    %49 = vector.shape_cast %48 : vector<1x12x48xf32> to vector<12x48xf32>
    %50 = arith.maximumf %47, %49 : vector<12x48xf32>
    %51 = vector.extract_strided_slice %9 {offsets = [14, 0, 0], sizes = [1, 12, 48], strides = [1, 1, 1]} : vector<16x12x48xf32> to vector<1x12x48xf32>
    %52 = vector.shape_cast %51 : vector<1x12x48xf32> to vector<12x48xf32>
    %53 = vector.extract_strided_slice %9 {offsets = [15, 0, 0], sizes = [1, 12, 48], strides = [1, 1, 1]} : vector<16x12x48xf32> to vector<1x12x48xf32>
    %54 = vector.shape_cast %53 : vector<1x12x48xf32> to vector<12x48xf32>
    %55 = arith.maximumf %52, %54 : vector<12x48xf32>
    %56 = arith.maximumf %50, %55 : vector<12x48xf32>
    %57 = vector.extract_strided_slice %23 {offsets = [0, 0], sizes = [8, 48], strides = [1, 1]} : vector<12x48xf32> to vector<8x48xf32>
    %c0_10 = arith.constant 0 : index
    %c0_11 = arith.constant 0 : index
    %c0_12 = arith.constant 0 : index
    %58 = vector.load %arg3[%c0_10, %c0_11, %c0_12] : memref<12x48x256xf32, #tpu.memory_space<vmem>>, vector<1x48x256xf32>
    %59 = vector.shape_cast %58 : vector<1x48x256xf32> to vector<48x256xf32>
    %cst_13 = arith.constant dense<0.000000e+00> : vector<8x256xf32>
    %60 = tpu.matmul %57, %59, %cst_13 {dimension_numbers = #tpu.dot_dimension_numbers<[1], [0], [0], [1], [0, 0, 1, 1], [], []>} : vector<8x48xf32>, vector<48x256xf32>, vector<8x256xf32> -> vector<8x256xf32>
    %61 = vector.extract_strided_slice %23 {offsets = [2, 0], sizes = [8, 48], strides = [1, 1]} : vector<12x48xf32> to vector<8x48xf32>
    %c1 = arith.constant 1 : index
    %c0_14 = arith.constant 0 : index
    %c0_15 = arith.constant 0 : index
    %62 = vector.load %arg3[%c1, %c0_14, %c0_15] : memref<12x48x256xf32, #tpu.memory_space<vmem>>, vector<1x48x256xf32>
    %63 = vector.shape_cast %62 : vector<1x48x256xf32> to vector<48x256xf32>
    %cst_16 = arith.constant dense<0.000000e+00> : vector<8x256xf32>
    %64 = tpu.matmul %61, %63, %cst_16 {dimension_numbers = #tpu.dot_dimension_numbers<[1], [0], [0], [1], [0, 0, 1, 1], [], []>} : vector<8x48xf32>, vector<48x256xf32>, vector<8x256xf32> -> vector<8x256xf32>
    %65 = arith.addf %60, %64 : vector<8x256xf32>
    %66 = vector.extract_strided_slice %23 {offsets = [4, 0], sizes = [8, 48], strides = [1, 1]} : vector<12x48xf32> to vector<8x48xf32>
    %c2 = arith.constant 2 : index
    %c0_17 = arith.constant 0 : index
    %c0_18 = arith.constant 0 : index
    %67 = vector.load %arg3[%c2, %c0_17, %c0_18] : memref<12x48x256xf32, #tpu.memory_space<vmem>>, vector<1x48x256xf32>
    %68 = vector.shape_cast %67 : vector<1x48x256xf32> to vector<48x256xf32>
    %cst_19 = arith.constant dense<0.000000e+00> : vector<8x256xf32>
    %69 = tpu.matmul %66, %68, %cst_19 {dimension_numbers = #tpu.dot_dimension_numbers<[1], [0], [0], [1], [0, 0, 1, 1], [], []>} : vector<8x48xf32>, vector<48x256xf32>, vector<8x256xf32> -> vector<8x256xf32>
    %70 = arith.addf %65, %69 : vector<8x256xf32>
    %71 = vector.extract_strided_slice %34 {offsets = [0, 0], sizes = [8, 48], strides = [1, 1]} : vector<12x48xf32> to vector<8x48xf32>
    %c3 = arith.constant 3 : index
    %c0_20 = arith.constant 0 : index
    %c0_21 = arith.constant 0 : index
    %72 = vector.load %arg3[%c3, %c0_20, %c0_21] : memref<12x48x256xf32, #tpu.memory_space<vmem>>, vector<1x48x256xf32>
    %73 = vector.shape_cast %72 : vector<1x48x256xf32> to vector<48x256xf32>
    %cst_22 = arith.constant dense<0.000000e+00> : vector<8x256xf32>
    %74 = tpu.matmul %71, %73, %cst_22 {dimension_numbers = #tpu.dot_dimension_numbers<[1], [0], [0], [1], [0, 0, 1, 1], [], []>} : vector<8x48xf32>, vector<48x256xf32>, vector<8x256xf32> -> vector<8x256xf32>
    %75 = arith.addf %70, %74 : vector<8x256xf32>
    %76 = vector.extract_strided_slice %34 {offsets = [2, 0], sizes = [8, 48], strides = [1, 1]} : vector<12x48xf32> to vector<8x48xf32>
    %c4 = arith.constant 4 : index
    %c0_23 = arith.constant 0 : index
    %c0_24 = arith.constant 0 : index
    %77 = vector.load %arg3[%c4, %c0_23, %c0_24] : memref<12x48x256xf32, #tpu.memory_space<vmem>>, vector<1x48x256xf32>
    %78 = vector.shape_cast %77 : vector<1x48x256xf32> to vector<48x256xf32>
    %cst_25 = arith.constant dense<0.000000e+00> : vector<8x256xf32>
    %79 = tpu.matmul %76, %78, %cst_25 {dimension_numbers = #tpu.dot_dimension_numbers<[1], [0], [0], [1], [0, 0, 1, 1], [], []>} : vector<8x48xf32>, vector<48x256xf32>, vector<8x256xf32> -> vector<8x256xf32>
    %80 = arith.addf %75, %79 : vector<8x256xf32>
    %81 = vector.extract_strided_slice %34 {offsets = [4, 0], sizes = [8, 48], strides = [1, 1]} : vector<12x48xf32> to vector<8x48xf32>
    %c5 = arith.constant 5 : index
    %c0_26 = arith.constant 0 : index
    %c0_27 = arith.constant 0 : index
    %82 = vector.load %arg3[%c5, %c0_26, %c0_27] : memref<12x48x256xf32, #tpu.memory_space<vmem>>, vector<1x48x256xf32>
    %83 = vector.shape_cast %82 : vector<1x48x256xf32> to vector<48x256xf32>
    %cst_28 = arith.constant dense<0.000000e+00> : vector<8x256xf32>
    %84 = tpu.matmul %81, %83, %cst_28 {dimension_numbers = #tpu.dot_dimension_numbers<[1], [0], [0], [1], [0, 0, 1, 1], [], []>} : vector<8x48xf32>, vector<48x256xf32>, vector<8x256xf32> -> vector<8x256xf32>
    %85 = arith.addf %80, %84 : vector<8x256xf32>
    %86 = vector.extract_strided_slice %45 {offsets = [0, 0], sizes = [8, 48], strides = [1, 1]} : vector<12x48xf32> to vector<8x48xf32>
    %c6 = arith.constant 6 : index
    %c0_29 = arith.constant 0 : index
    %c0_30 = arith.constant 0 : index
    %87 = vector.load %arg3[%c6, %c0_29, %c0_30] : memref<12x48x256xf32, #tpu.memory_space<vmem>>, vector<1x48x256xf32>
    %88 = vector.shape_cast %87 : vector<1x48x256xf32> to vector<48x256xf32>
    %cst_31 = arith.constant dense<0.000000e+00> : vector<8x256xf32>
    %89 = tpu.matmul %86, %88, %cst_31 {dimension_numbers = #tpu.dot_dimension_numbers<[1], [0], [0], [1], [0, 0, 1, 1], [], []>} : vector<8x48xf32>, vector<48x256xf32>, vector<8x256xf32> -> vector<8x256xf32>
    %90 = arith.addf %85, %89 : vector<8x256xf32>
    %91 = vector.extract_strided_slice %45 {offsets = [2, 0], sizes = [8, 48], strides = [1, 1]} : vector<12x48xf32> to vector<8x48xf32>
    %c7 = arith.constant 7 : index
    %c0_32 = arith.constant 0 : index
    %c0_33 = arith.constant 0 : index
    %92 = vector.load %arg3[%c7, %c0_32, %c0_33] : memref<12x48x256xf32, #tpu.memory_space<vmem>>, vector<1x48x256xf32>
    %93 = vector.shape_cast %92 : vector<1x48x256xf32> to vector<48x256xf32>
    %cst_34 = arith.constant dense<0.000000e+00> : vector<8x256xf32>
    %94 = tpu.matmul %91, %93, %cst_34 {dimension_numbers = #tpu.dot_dimension_numbers<[1], [0], [0], [1], [0, 0, 1, 1], [], []>} : vector<8x48xf32>, vector<48x256xf32>, vector<8x256xf32> -> vector<8x256xf32>
    %95 = arith.addf %90, %94 : vector<8x256xf32>
    %96 = vector.extract_strided_slice %45 {offsets = [4, 0], sizes = [8, 48], strides = [1, 1]} : vector<12x48xf32> to vector<8x48xf32>
    %c8 = arith.constant 8 : index
    %c0_35 = arith.constant 0 : index
    %c0_36 = arith.constant 0 : index
    %97 = vector.load %arg3[%c8, %c0_35, %c0_36] : memref<12x48x256xf32, #tpu.memory_space<vmem>>, vector<1x48x256xf32>
    %98 = vector.shape_cast %97 : vector<1x48x256xf32> to vector<48x256xf32>
    %cst_37 = arith.constant dense<0.000000e+00> : vector<8x256xf32>
    %99 = tpu.matmul %96, %98, %cst_37 {dimension_numbers = #tpu.dot_dimension_numbers<[1], [0], [0], [1], [0, 0, 1, 1], [], []>} : vector<8x48xf32>, vector<48x256xf32>, vector<8x256xf32> -> vector<8x256xf32>
    %100 = arith.addf %95, %99 : vector<8x256xf32>
    %101 = vector.extract_strided_slice %56 {offsets = [0, 0], sizes = [8, 48], strides = [1, 1]} : vector<12x48xf32> to vector<8x48xf32>
    %c9 = arith.constant 9 : index
    %c0_38 = arith.constant 0 : index
    %c0_39 = arith.constant 0 : index
    %102 = vector.load %arg3[%c9, %c0_38, %c0_39] : memref<12x48x256xf32, #tpu.memory_space<vmem>>, vector<1x48x256xf32>
    %103 = vector.shape_cast %102 : vector<1x48x256xf32> to vector<48x256xf32>
    %cst_40 = arith.constant dense<0.000000e+00> : vector<8x256xf32>
    %104 = tpu.matmul %101, %103, %cst_40 {dimension_numbers = #tpu.dot_dimension_numbers<[1], [0], [0], [1], [0, 0, 1, 1], [], []>} : vector<8x48xf32>, vector<48x256xf32>, vector<8x256xf32> -> vector<8x256xf32>
    %105 = arith.addf %100, %104 : vector<8x256xf32>
    %106 = vector.extract_strided_slice %56 {offsets = [2, 0], sizes = [8, 48], strides = [1, 1]} : vector<12x48xf32> to vector<8x48xf32>
    %c10 = arith.constant 10 : index
    %c0_41 = arith.constant 0 : index
    %c0_42 = arith.constant 0 : index
    %107 = vector.load %arg3[%c10, %c0_41, %c0_42] : memref<12x48x256xf32, #tpu.memory_space<vmem>>, vector<1x48x256xf32>
    %108 = vector.shape_cast %107 : vector<1x48x256xf32> to vector<48x256xf32>
    %cst_43 = arith.constant dense<0.000000e+00> : vector<8x256xf32>
    %109 = tpu.matmul %106, %108, %cst_43 {dimension_numbers = #tpu.dot_dimension_numbers<[1], [0], [0], [1], [0, 0, 1, 1], [], []>} : vector<8x48xf32>, vector<48x256xf32>, vector<8x256xf32> -> vector<8x256xf32>
    %110 = arith.addf %105, %109 : vector<8x256xf32>
    %111 = vector.extract_strided_slice %56 {offsets = [4, 0], sizes = [8, 48], strides = [1, 1]} : vector<12x48xf32> to vector<8x48xf32>
    %c11 = arith.constant 11 : index
    %c0_44 = arith.constant 0 : index
    %c0_45 = arith.constant 0 : index
    %112 = vector.load %arg3[%c11, %c0_44, %c0_45] : memref<12x48x256xf32, #tpu.memory_space<vmem>>, vector<1x48x256xf32>
    %113 = vector.shape_cast %112 : vector<1x48x256xf32> to vector<48x256xf32>
    %cst_46 = arith.constant dense<0.000000e+00> : vector<8x256xf32>
    %114 = tpu.matmul %111, %113, %cst_46 {dimension_numbers = #tpu.dot_dimension_numbers<[1], [0], [0], [1], [0, 0, 1, 1], [], []>} : vector<8x48xf32>, vector<48x256xf32>, vector<8x256xf32> -> vector<8x256xf32>
    %115 = arith.addf %110, %114 : vector<8x256xf32>
    %c0_47 = arith.constant 0 : index
    %c0_48 = arith.constant 0 : index
    %116 = vector.load %arg2[%c0_47, %c0_48] : memref<1x256xf32, #tpu.memory_space<vmem>>, vector<1x256xf32>
    %117 = vector.broadcast %116 : vector<1x256xf32> to vector<8x256xf32>
    %118 = arith.addf %115, %117 : vector<8x256xf32>
    %c0_49 = arith.constant 0 : index
    %c0_50 = arith.constant 0 : index
    %119 = vector.load %arg8[%c0_49, %c0_50] : memref<8x256xf32, #tpu.memory_space<vmem>>, vector<8x256xf32>
    %120 = arith.addf %119, %118 : vector<8x256xf32>
    %cst_51 = arith.constant 1.000000e+00 : f32
    %121 = vector.broadcast %cst_51 : f32 to vector<8x256xf32>
    %122 = arith.cmpf oge, %120, %121 : vector<8x256xf32>
    %123 = arith.extui %122 : vector<8x256xi1> to vector<8x256xi32>
    %124 = arith.sitofp %123 : vector<8x256xi32> to vector<8x256xf32>
    %cst_52 = arith.constant 0.000000e+00 : f32
    %125 = vector.broadcast %cst_52 : f32 to vector<8x256xf32>
    %126 = arith.select %122, %125, %120 : vector<8x256xi1>, vector<8x256xf32>
    %c0_53 = arith.constant 0 : index
    %c0_54 = arith.constant 0 : index
    %127 = vector.load %arg8[%c0_53, %c0_54] : memref<8x256xf32, #tpu.memory_space<vmem>>, vector<8x256xf32>
    tpu.vector_store %arg8[%c0_53, %c0_54], %126 {strides = array<i32>} : memref<8x256xf32, #tpu.memory_space<vmem>>, vector<8x256xf32>,
    %128 = vector.extract_strided_slice %124 {offsets = [0, 0], sizes = [8, 64], strides = [1, 1]} : vector<8x256xf32> to vector<8x64xf32>
    %129 = vector.extract_strided_slice %124 {offsets = [0, 64], sizes = [8, 64], strides = [1, 1]} : vector<8x256xf32> to vector<8x64xf32>
    %130 = arith.maximumf %128, %129 : vector<8x64xf32>
    %131 = vector.extract_strided_slice %124 {offsets = [0, 128], sizes = [8, 64], strides = [1, 1]} : vector<8x256xf32> to vector<8x64xf32>
    %132 = vector.extract_strided_slice %124 {offsets = [0, 192], sizes = [8, 64], strides = [1, 1]} : vector<8x256xf32> to vector<8x64xf32>
    %133 = arith.maximumf %131, %132 : vector<8x64xf32>
    %134 = arith.maximumf %130, %133 : vector<8x64xf32>
    %c0_55 = arith.constant 0 : index
    %c0_56 = arith.constant 0 : index
    %c0_57 = arith.constant 0 : index
    %135 = vector.load %arg6[%c0_55, %c0_56, %c0_57] : memref<1x8x64xf32, #tpu.memory_space<vmem>>, vector<1x8x64xf32>
    %136 = vector.shape_cast %135 : vector<1x8x64xf32> to vector<8x64xf32>
    %137 = vector.shape_cast %134 : vector<8x64xf32> to vector<1x8x64xf32>
    tpu.vector_store %arg6[%c0_55, %c0_56, %c0_57], %137 {strides = array<i32>} : memref<1x8x64xf32, #tpu.memory_space<vmem>>, vector<1x8x64xf32>,
    %138 = vector.extract_strided_slice %134 {offsets = [0, 0], sizes = [2, 64], strides = [1, 1]} : vector<8x64xf32> to vector<2x64xf32>
    %c0_58 = arith.constant 0 : index
    %c0_59 = arith.constant 0 : index
    %c0_60 = arith.constant 0 : index
    %139 = vector.load %arg4[%c0_58, %c0_59, %c0_60] : memref<4x64x10xf32, #tpu.memory_space<vmem>>, vector<1x64x10xf32>
    %140 = vector.shape_cast %139 : vector<1x64x10xf32> to vector<64x10xf32>
    %cst_61 = arith.constant dense<0.000000e+00> : vector<2x10xf32>
    %141 = tpu.matmul %138, %140, %cst_61 {dimension_numbers = #tpu.dot_dimension_numbers<[1], [0], [0], [1], [0, 0, 1, 1], [], []>} : vector<2x64xf32>, vector<64x10xf32>, vector<2x10xf32> -> vector<2x10xf32>
    %142 = vector.extract_strided_slice %134 {offsets = [2, 0], sizes = [2, 64], strides = [1, 1]} : vector<8x64xf32> to vector<2x64xf32>
    %c1_62 = arith.constant 1 : index
    %c0_63 = arith.constant 0 : index
    %c0_64 = arith.constant 0 : index
    %143 = vector.load %arg4[%c1_62, %c0_63, %c0_64] : memref<4x64x10xf32, #tpu.memory_space<vmem>>, vector<1x64x10xf32>
    %144 = vector.shape_cast %143 : vector<1x64x10xf32> to vector<64x10xf32>
    %cst_65 = arith.constant dense<0.000000e+00> : vector<2x10xf32>
    %145 = tpu.matmul %142, %144, %cst_65 {dimension_numbers = #tpu.dot_dimension_numbers<[1], [0], [0], [1], [0, 0, 1, 1], [], []>} : vector<2x64xf32>, vector<64x10xf32>, vector<2x10xf32> -> vector<2x10xf32>
    %146 = arith.addf %141, %145 : vector<2x10xf32>
    %147 = vector.extract_strided_slice %134 {offsets = [4, 0], sizes = [2, 64], strides = [1, 1]} : vector<8x64xf32> to vector<2x64xf32>
    %c2_66 = arith.constant 2 : index
    %c0_67 = arith.constant 0 : index
    %c0_68 = arith.constant 0 : index
    %148 = vector.load %arg4[%c2_66, %c0_67, %c0_68] : memref<4x64x10xf32, #tpu.memory_space<vmem>>, vector<1x64x10xf32>
    %149 = vector.shape_cast %148 : vector<1x64x10xf32> to vector<64x10xf32>
    %cst_69 = arith.constant dense<0.000000e+00> : vector<2x10xf32>
    %150 = tpu.matmul %147, %149, %cst_69 {dimension_numbers = #tpu.dot_dimension_numbers<[1], [0], [0], [1], [0, 0, 1, 1], [], []>} : vector<2x64xf32>, vector<64x10xf32>, vector<2x10xf32> -> vector<2x10xf32>
    %151 = arith.addf %146, %150 : vector<2x10xf32>
    %152 = vector.extract_strided_slice %134 {offsets = [6, 0], sizes = [2, 64], strides = [1, 1]} : vector<8x64xf32> to vector<2x64xf32>
    %c3_70 = arith.constant 3 : index
    %c0_71 = arith.constant 0 : index
    %c0_72 = arith.constant 0 : index
    %153 = vector.load %arg4[%c3_70, %c0_71, %c0_72] : memref<4x64x10xf32, #tpu.memory_space<vmem>>, vector<1x64x10xf32>
    %154 = vector.shape_cast %153 : vector<1x64x10xf32> to vector<64x10xf32>
    %cst_73 = arith.constant dense<0.000000e+00> : vector<2x10xf32>
    %155 = tpu.matmul %152, %154, %cst_73 {dimension_numbers = #tpu.dot_dimension_numbers<[1], [0], [0], [1], [0, 0, 1, 1], [], []>} : vector<2x64xf32>, vector<64x10xf32>, vector<2x10xf32> -> vector<2x10xf32>
    %156 = arith.addf %151, %155 : vector<2x10xf32>
    %c0_74 = arith.constant 0 : index
    %c0_75 = arith.constant 0 : index
    %157 = vector.load %arg9[%c0_74, %c0_75] : memref<2x10xf32, #tpu.memory_space<vmem>>, vector<2x10xf32>
    %158 = arith.addf %157, %156 : vector<2x10xf32>
    %cst_76 = arith.constant 1.000000e+00 : f32
    %159 = vector.broadcast %cst_76 : f32 to vector<2x10xf32>
    %160 = arith.cmpf oge, %158, %159 : vector<2x10xf32>
    %cst_77 = arith.constant 0.000000e+00 : f32
    %161 = vector.broadcast %cst_77 : f32 to vector<2x10xf32>
    %162 = arith.select %160, %161, %158 : vector<2x10xi1>, vector<2x10xf32>
    %c0_78 = arith.constant 0 : index
    %c0_79 = arith.constant 0 : index
    %163 = vector.load %arg9[%c0_78, %c0_79] : memref<2x10xf32, #tpu.memory_space<vmem>>, vector<2x10xf32>
    tpu.vector_store %arg9[%c0_78, %c0_79], %162 {strides = array<i32>} : memref<2x10xf32, #tpu.memory_space<vmem>>, vector<2x10xf32>,
    %c0_80 = arith.constant 0 : index
    %c0_81 = arith.constant 0 : index
    %164 = vector.load %arg5[%c0_80, %c0_81] : memref<2x10xf32, #tpu.memory_space<vmem>>, vector<2x10xf32>
    %165 = arith.extui %160 : vector<2x10xi1> to vector<2x10xi32>
    %166 = arith.sitofp %165 : vector<2x10xi32> to vector<2x10xf32>
    %167 = arith.addf %164, %166 : vector<2x10xf32>
    %c0_82 = arith.constant 0 : index
    %c0_83 = arith.constant 0 : index
    %168 = vector.load %arg5[%c0_82, %c0_83] : memref<2x10xf32, #tpu.memory_space<vmem>>, vector<2x10xf32>
    tpu.vector_store %arg5[%c0_82, %c0_83], %167 {strides = array<i32>} : memref<2x10xf32, #tpu.memory_space<vmem>>, vector<2x10xf32>,
    return
  }
  func.func @transform_0(%arg0: i32) -> (i32, i32, i32) {
    %c0_i32 = arith.constant 0 : i32
    %c0_i32_0 = arith.constant 0 : i32
    %c0_i32_1 = arith.constant 0 : i32
    %c0_i32_2 = arith.constant 0 : i32
    return %c0_i32, %c0_i32_0, %c0_i32_1 : i32, i32, i32
  }
  func.func @transform_1(%arg0: i32) -> (i32, i32) {
    %c0_i32 = arith.constant 0 : i32
    %c0_i32_0 = arith.constant 0 : i32
    %c0_i32_1 = arith.constant 0 : i32
    return %c0_i32, %c0_i32_0 : i32, i32
  }
  func.func @transform_2(%arg0: i32) -> (i32, i32, i32) {
    %c0_i32 = arith.constant 0 : i32
    %c0_i32_0 = arith.constant 0 : i32
    %c0_i32_1 = arith.constant 0 : i32
    %c0_i32_2 = arith.constant 0 : i32
    return %c0_i32, %c0_i32_0, %c0_i32_1 : i32, i32, i32
  }
  func.func @transform_3(%arg0: i32) -> (i32, i32, i32) {
    %c0_i32 = arith.constant 0 : i32
    %c0_i32_0 = arith.constant 0 : i32
    %c0_i32_1 = arith.constant 0 : i32
    %c0_i32_2 = arith.constant 0 : i32
    return %c0_i32, %c0_i32_0, %c0_i32_1 : i32, i32, i32
  }
  func.func @transform_4(%arg0: i32) -> (i32, i32) {
    %c0_i32 = arith.constant 0 : i32
    %c0_i32_0 = arith.constant 0 : i32
    %c0_i32_1 = arith.constant 0 : i32
    return %c0_i32, %c0_i32_0 : i32, i32
  }
  func.func @transform_5(%arg0: i32) -> (i32, i32, i32) {
    %c0_i32 = arith.constant 0 : i32
    %c0_i32_0 = arith.constant 0 : i32
    %c0_i32_1 = arith.constant 0 : i32
    return %arg0, %c0_i32, %c0_i32_0 : i32, i32, i32
  }
}

</mosaic_0001>

<bundles_post_ra>
// kernel: snn_forward.2
= control target key start
LH: loop header
LB: loop body
LE: loop exit
PB: predicated region body
PF: predicated region fallthrough
CT: control target
= control target key end

     0   :  { %s605_s12 = smov 0   ;;  %s712_s0 = inlined_call_operand.vmem [shape: f32[1152,25], index: 0, kind: input, shape index: {}]   ;;  %s713_s1 = inlined_call_operand.vmem [shape: f32[25,8], index: 1, kind: input, shape index: {}]   ;;  %s714_s2 = inlined_call_operand.vmem [shape: f32[1,8], index: 2, kind: input, shape index: {}]   ;;  %s715_s3 = inlined_call_operand.vmem [shape: f32[1152,8], index: 3, kind: output, shape index: {}]  }
   0x1 LB: > { %s472_s13 = sadd.s32 4294967295, %s582_s12   ;;  %p476_p0 = scmp.ge.s32.totalorder %s582_s12, 1  ;;  %s582_s12 = sphi %s605_s12, %s13_s12  }
   0x2   : > { %p138_p1 = scmp.lt.s32.totalorder %s582_s12, 10 }
   0x4   : > { %p139_p2 = pnand %p476_p0, %p138_p1 }
   0x5   : > { %v190_v0 = vld [vmem:[%s713_s1] sm:$0xff] (!%p139_p2)  ;;  %v191_v1 = vld [vmem:[%s713_s1 + $0x8] sm:$0xff] (!%p139_p2)  ;;  %v192_v2 = vld [vmem:[%s713_s1 + $0x10] sm:$0xff] (!%p139_p2)  ;;  %vm250_vm0 = vcmask (!%p139_p2), 1040384   ;;  %s477_s20 = sshll.u32 (!%p139_p2), %s472_s13, 4  ;;  %vm584_vm1 = vmmov (!%p139_p2), 1  }
   0x6   : > { %142 = sbr.rel (%p139_p2) target bundleno = 247 (0xf7), region = 32  ;;  %v553_v3 = vpack.c.bf16 (!%p139_p2), %v191_v1, %v190_v0  ;;  %v193_v4 = vld [vmem:[%s713_s1 + $0x18] sm:$0x1] (!%p139_p2)  ;;  %p163_p3 = scmp.lt.s32.totalorder (!%p139_p2), %s477_s20, 143  ;;  %vm558_vm2 = vmpackc.low (!%p139_p2), %vm250_vm0, %vm584_vm1  ;;  %vm201_vm3 = vcmask (!%p139_p2), 203776   ;;  %vm399_vm4 = vcmask (!%p139_p2), 64512  }
   0x7   : > { %v557_v5 = vpack.c.bf16 (!%p139_p2), %v193_v4, %v192_v2  ;;  %v481_v22 = vld [vmem:[%s714_s2] ss:$0 sm:$0xff] (!%p139_p2) }
   0x8   : > { %554 = vmatprep.subr.bf16.mxu0 (!%p139_p2), %v553_v3  ;;  %563 = vmatprep.subr.bf16.mxu1 (!%p139_p2), %v553_v3 }
   0x9   : > { %556 = vmatpush3.bf16.msra.mxu0 (!%p139_p2), %v553_v3  ;;  %565 = vmatpush3.bf16.msra.mxu1 (!%p139_p2), %v553_v3 }
   0xa   : > { %559 = vmatprep.subr.msk.bf16.mxu0 (!%p139_p2), %vm558_vm2, %v557_v5  ;;  %564 = vmatprep.subr.msk.bf16.mxu1 (!%p139_p2), %vm558_vm2, %v557_v5 }
   0xd   : > { %s717_s20 = smov (!%p163_p3, %s477_s20), 143  ;;  %562 = vmatpush3.bf16.msk.msra.mxu0 %vm558_vm2, %v557_v5  ;;  %566 = vmatpush3.bf16.msk.msra.mxu1 %vm558_vm2, %v557_v5 }
   0xe   : > { %s478_s23 = sshll.u32 %s717_s20, 3 }
   0xf   : > { %s633_s26 = scalar_lea.vmem %s712_s0, %s478_s23  ;;  %s675_s4 = scalar_lea.vmem %s715_s3, %s478_s23 }
  0x10   : > { %v174_v6 = vld [vmem:[%s633_s26] sm:$0xff]  ;;  %v175_v8 = vld [vmem:[%s633_s26 + $0x8] sm:$0xff]  ;;  %v176_v10 = vld [vmem:[%s633_s26 + $0x10] sm:$0xff] }
  0x11   : > { %v182_v7 = vld [vmem:[%s633_s26 + $0x40] sm:$0xff]  ;;  %v183_v9 = vld [vmem:[%s633_s26 + $0x48] sm:$0xff]  ;;  %529 = vmatprep.mubr.msk.f32.mxu0 %vm201_vm3, %v174_v6  ;;  %v184_v11 = vld [vmem:[%s633_s26 + $0x50] sm:$0xff] }
  0x12   : > { %541 = vmatprep.mubr.msk.f32.mxu1 %vm201_vm3, %v182_v7  ;;  %530 = vmatmul.mubr.msk.f32.vlgmr.msra.gmra.mrb[0].mxu0 %vm201_vm3, %v175_v8  ;;  %v177_v12 = vld [vmem:[%s633_s26 + $0x18] sm:$0xff]  ;;  %v178_v14 = vld [vmem:[%s633_s26 + $0x20] sm:$0xff]  ;;  %v179_v16 = vld [vmem:[%s633_s26 + $0x28] sm:$0xff] }
  0x13   : > { %542 = vmatmul.mubr.msk.f32.vlgmr.msra.gmra.mrb[0].mxu1 %vm201_vm3, %v183_v9  ;;  %532 = vmatprep.mubr.msk.f32.mxu0 %vm201_vm3, %v176_v10  ;;  %v185_v13 = vld [vmem:[%s633_s26 + $0x58] sm:$0xff]  ;;  %v186_v15 = vld [vmem:[%s633_s26 + $0x60] sm:$0xff]  ;;  %v187_v17 = vld [vmem:[%s633_s26 + $0x68] sm:$0xff] }
  0x14   : > { %544 = vmatprep.mubr.msk.f32.mxu1 %vm201_vm3, %v184_v11  ;;  %v180_v18 = vld [vmem:[%s633_s26 + $0x30] sm:$0xff]  ;;  %v181_v20 = vld [vmem:[%s633_s26 + $0x38] sm:$0xff] }
  0x15   : > { %v188_v19 = vld [vmem:[%s633_s26 + $0x70] sm:$0xff]  ;;  %v189_v21 = vld [vmem:[%s633_s26 + $0x78] sm:$0xff] }
  0x16   : > { %533 = vmatmul.mubr.msk.f32.gmra.mrb[2].mxu0 %vm201_vm3, %v177_v12 }
  0x17   : > { %545 = vmatmul.mubr.msk.f32.gmra.mrb[2].mxu1 %vm201_vm3, %v185_v13  ;;  %535 = vmatprep.mubr.msk.f32.mxu0 %vm201_vm3, %v178_v14 }
  0x18   : > { %547 = vmatprep.mubr.msk.f32.mxu1 %vm201_vm3, %v186_v15 }
  0x1a   : > { %536 = vmatmul.mubr.msk.f32.gmra.mrb[4].mxu0 %vm201_vm3, %v179_v16 }
  0x1b   : > { %548 = vmatmul.mubr.msk.f32.gmra.mrb[4].mxu1 %vm201_vm3, %v187_v17  ;;  %538 = vmatprep.mubr.msk.f32.mxu0 %vm201_vm3, %v180_v18 }
  0x1c   : > { %550 = vmatprep.mubr.msk.f32.mxu1 %vm201_vm3, %v188_v19 }
  0x1e   : > { %539 = vmatmul.mubr.msk.f32.gmra.mrb[6].mxu0 %vm201_vm3, %v181_v20 }
  0x1f   : > { %551 = vmatmul.mubr.msk.f32.gmra.mrb[6].mxu1 %vm201_vm3, %v189_v21 }
  0xe5   : > { %v531_v23 = vpop.f32.mrb[0].mxu0 }
  0xe6   : > { %v543_v24 = vpop.f32.mrb[0].mxu1  ;;  %v326_v25 = vadd.f32 %v531_v23, %v481_v22  ;;  %v320_v27 = vpop.f32.mrb[1].mxu0 }
  0xe7   : > { %v366_v26 = vadd.f32 %v543_v24, %v481_v22  ;;  %v360_v28 = vpop.f32.mrb[1].mxu1  ;;  %v321_v29 = vadd.f32 %v481_v22, %v320_v27 }
  0xe8   : > { %v361_v30 = vadd.f32 %v481_v22, %v360_v28  ;;  %401 = vst.msk [vmem:[%s675_s4 + $0x8] sm:$0xff] %vm399_vm4, %v326_v25 }
  0xe9   : > { %409 = vst.msk [vmem:[%s675_s4 + $0x48] sm:$0xff] %vm399_vm4, %v366_v26  ;;  %400 = vst.msk [vmem:[%s675_s4] sm:$0xff] %vm399_vm4, %v321_v29  ;;  %v534_v31 = vpop.f32.mrb[2].mxu0 }
  0xea   : > { %408 = vst.msk [vmem:[%s675_s4 + $0x40] sm:$0xff] %vm399_vm4, %v361_v30  ;;  %v546_v32 = vpop.f32.mrb[2].mxu1  ;;  %v336_v33 = vadd.f32 %v534_v31, %v481_v22  ;;  %v330_v35 = vpop.f32.mrb[3].mxu0 }
  0xeb   : > { %v376_v34 = vadd.f32 %v546_v32, %v481_v22  ;;  %v370_v36 = vpop.f32.mrb[3].mxu1  ;;  %v331_v37 = vadd.f32 %v481_v22, %v330_v35 }
  0xec   : > { %v371_v38 = vadd.f32 %v481_v22, %v370_v36  ;;  %403 = vst.msk [vmem:[%s675_s4 + $0x18] sm:$0xff] %vm399_vm4, %v336_v33 }
  0xed   : > { %411 = vst.msk [vmem:[%s675_s4 + $0x58] sm:$0xff] %vm399_vm4, %v376_v34  ;;  %402 = vst.msk [vmem:[%s675_s4 + $0x10] sm:$0xff] %vm399_vm4, %v331_v37  ;;  %v537_v39 = vpop.f32.mrb[4].mxu0 }
  0xee   : > { %410 = vst.msk [vmem:[%s675_s4 + $0x50] sm:$0xff] %vm399_vm4, %v371_v38  ;;  %v549_v40 = vpop.f32.mrb[4].mxu1  ;;  %v346_v41 = vadd.f32 %v537_v39, %v481_v22  ;;  %v340_v43 = vpop.f32.mrb[5].mxu0 }
  0xef   : > { %v386_v42 = vadd.f32 %v549_v40, %v481_v22  ;;  %v380_v44 = vpop.f32.mrb[5].mxu1  ;;  %v341_v45 = vadd.f32 %v481_v22, %v340_v43 }
  0xf0   : > { %v381_v46 = vadd.f32 %v481_v22, %v380_v44  ;;  %405 = vst.msk [vmem:[%s675_s4 + $0x28] sm:$0xff] %vm399_vm4, %v346_v41 }
  0xf1   : > { %413 = vst.msk [vmem:[%s675_s4 + $0x68] sm:$0xff] %vm399_vm4, %v386_v42  ;;  %404 = vst.msk [vmem:[%s675_s4 + $0x20] sm:$0xff] %vm399_vm4, %v341_v45  ;;  %v540_v47 = vpop.f32.mrb[6].mxu0 }
  0xf2   : > { %412 = vst.msk [vmem:[%s675_s4 + $0x60] sm:$0xff] %vm399_vm4, %v381_v46  ;;  %v552_v48 = vpop.f32.mrb[6].mxu1  ;;  %v356_v49 = vadd.f32 %v540_v47, %v481_v22  ;;  %v350_v51 = vpop.f32.mrb[7].mxu0 }
  0xf3   : > { %v396_v50 = vadd.f32 %v552_v48, %v481_v22  ;;  %v390_v52 = vpop.f32.mrb[7].mxu1  ;;  %v351_v53 = vadd.f32 %v481_v22, %v350_v51 }
  0xf4   : > { %v391_v54 = vadd.f32 %v481_v22, %v390_v52  ;;  %407 = vst.msk [vmem:[%s675_s4 + $0x38] sm:$0xff] %vm399_vm4, %v356_v49 }
  0xf5   : > { %415 = vst.msk [vmem:[%s675_s4 + $0x78] sm:$0xff] %vm399_vm4, %v396_v50  ;;  %406 = vst.msk [vmem:[%s675_s4 + $0x30] sm:$0xff] %vm399_vm4, %v351_v53 }
  0xf6   : > { %414 = vst.msk [vmem:[%s675_s4 + $0x70] sm:$0xff] %vm399_vm4, %v391_v54 }
  0xf7 PF: > { %s13_s12 = sadd.s32 1, %s582_s12  }
  0xf8   : > { %p10_p4 = scmp.ge.s32.totalorder %s13_s12, 11  }
  0xfa   :  { %12 = sbr.rel (!%p10_p4) target bundleno = 1 (0x1), region = 62 }

// kernel: tile.8
= control target key start
LH: loop header
LB: loop body
LE: loop exit
PB: predicated region body
PF: predicated region fallthrough
CT: control target
= control target key end

     0   :  { %s28_s0 = inlined_call_operand.vmem [shape: f32[16], index: 0, kind: input, shape index: {}]   ;;  %s29_s1 = inlined_call_operand.vmem [shape: f32[16,16], index: 1, kind: output, shape index: {}]  }
   0x1   :  { %v4_v0 = vld [vmem:[%s28_s0] ss:$0 sm:$0xff] }
   0x2   :  { %5 = vst [vmem:[%s29_s1] sm:$0xff] %v4_v0  ;;  %8 = vst [vmem:[%s29_s1 + $0x8] sm:$0xff] %v4_v0 }

// kernel: tile.9
= control target key start
LH: loop header
LB: loop body
LE: loop exit
PB: predicated region body
PF: predicated region fallthrough
CT: control target
= control target key end

     0   :  { %s7_s6 = smov 3  ;;  %s21_s9 = smov 3  ;;  %vm4_vm0 = vcmask 130048   ;;  %vm11_vm1 = vcmask 1048448   ;;  %vm18_vm2 = vcmask 917248   ;;  %vm25_vm3 = vcmask 786048   ;;  %s128_s0 = inlined_call_operand.vmem [shape: f32[16,16], index: 0, kind: input, shape index: {}]   ;;  %s129_s1 = inlined_call_operand.vmem [shape: f32[1,256], index: 1, kind: output, shape index: {}]  }
   0x1   :  { %v66_v0 = vld [vmem:[%s128_s0 + $0x7] ss:$8 sm:%s7_s6]   ;;  %s81_s10 = smov 112   ;;  %v68_v1 = vld [vmem:[%s128_s0 + $0x5] ss:$8 sm:%s21_s9]   ;;  %s14_s13 = smov 3 }
   0x2   :  { %9 = vrot.lane.b32.xlu0 %v66_v0, %s81_s10  ;;  %s82_s14 = smov 80   ;;  %v67_v2 = vld [vmem:[%s128_s0 + $0x6] ss:$8 sm:%s14_s13]   ;;  %s28_s17 = smov 3  ;;  %vm32_vm4 = vcmask 654848   ;;  %vm39_vm5 = vcmask 523648  }
   0x3   :  { %23 = vrot.lane.b32.xlu1 %v68_v1, %s82_s14  ;;  %v69_v3 = vld [vmem:[%s128_s0 + $0x4] ss:$8 sm:%s28_s17]   ;;  %s35_s20 = smov 3  ;;  %s42_s21 = smov 3  ;;  %vm46_vm6 = vcmask 392448   ;;  %vm53_vm7 = vcmask 261248  }
   0x4   :  { %s83_s22 = smov 96   ;;  %s84_s23 = smov 64   ;;  %v70_v4 = vld [vmem:[%s128_s0 + $0x3] ss:$8 sm:%s35_s20]   ;;  %v71_v5 = vld [vmem:[%s128_s0 + $0x2] ss:$8 sm:%s42_s21]  }
   0x5   :  { %s2_s26 = smov 3  ;;  %s49_s29 = smov 3 }
   0x6   :  { %16 = vrot.lane.b32.xlu0 %v67_v2, %s83_s22  ;;  %v3_v6 = vld [vmem:[%s128_s0] ss:$8 sm:%s2_s26]   ;;  %s85_s3 = smov 48   ;;  %s86_s4 = smov 32  }
   0x7   :  { %30 = vrot.lane.b32.xlu1 %v69_v3, %s84_s23  ;;  %5 = vst.msk [vmem:[#allocation0] ss:$8 sm:$0x3] %vm4_vm0, %v3_v6   ;;  %v72_v7 = vld [vmem:[%s128_s0 + $0x1] ss:$8 sm:%s49_s29]   ;;  %s87_s0 = smov 16  }
   0xa   :  { %37 = vrot.lane.b32.xlu0 %v70_v4, %s85_s3 }
   0xb   :  { %44 = vrot.lane.b32.xlu1 %v71_v5, %s86_s4 }
   0xe   :  { %51 = vrot.lane.b32.xlu0 %v72_v7, %s87_s0 }
  0x74   :  { %v10_v8 = vpop.permute.xlu0 %9  }
  0x75   :  { %12 = vst.msk [vmem:[#allocation0] ss:$8 sm:$0x3] %vm11_vm1, %v10_v8   ;;  %v24_v9 = vpop.permute.xlu1 %23  }
  0x78   :  { %v17_v10 = vpop.permute.xlu0 %16  }
  0x79   :  { %19 = vst.msk [vmem:[#allocation0] ss:$8 sm:$0x3] %vm18_vm2, %v17_v10   ;;  %v31_v11 = vpop.permute.xlu1 %30  }
  0x7a   :  { %26 = vst.msk [vmem:[#allocation0] ss:$8 sm:$0x3] %vm25_vm3, %v24_v9  }
  0x7b   :  { %33 = vst.msk [vmem:[#allocation0] ss:$8 sm:$0x3] %vm32_vm4, %v31_v11  }
  0x7c   :  { %v38_v12 = vpop.permute.xlu0 %37  }
  0x7d   :  { %40 = vst.msk [vmem:[#allocation0] ss:$8 sm:$0x3] %vm39_vm5, %v38_v12   ;;  %v45_v13 = vpop.permute.xlu1 %44  }
  0x7e   :  { %47 = vst.msk [vmem:[#allocation0] ss:$8 sm:$0x3] %vm46_vm6, %v45_v13  }
  0x80   :  { %v52_v14 = vpop.permute.xlu0 %51  }
  0x81   :  { %54 = vst.msk [vmem:[#allocation0] ss:$8 sm:$0x3] %vm53_vm7, %v52_v14  }
  0x88   :  { %v58_v15 = vld [vmem:[#allocation0] sm:$0x1]  ;;  %v62_v16 = vld [vmem:[#allocation0 + $0x8] sm:$0x1] }
  0x89   :  { %60 = vst [vmem:[%s129_s1] sm:$0x1] %v58_v15  ;;  %73 = vst [vmem:[%s129_s1 + $0x1] sm:$0x1] %v62_v16 }

// kernel: snn_forward.3
= control target key start
LH: loop header
LB: loop body
LE: loop exit
PB: predicated region body
PF: predicated region fallthrough
CT: control target
= control target key end

     0   :  { %s2641_s18 = smov 0   ;;  %s3739_s0 = inlined_call_operand.vmem [shape: f32[16,12,48], index: 0, kind: input, shape index: {}]   ;;  %s3740_s1 = inlined_call_operand.vmem [shape: f32[1,256], index: 1, kind: input, shape index: {}]   ;;  %s3741_s2 = inlined_call_operand.vmem [shape: f32[12,48,256], index: 2, kind: input, shape index: {}]   ;;  %s3742_s3 = inlined_call_operand.vmem [shape: f32[4,64,10], index: 3, kind: input, shape index: {}]   ;;  %s3743_s4 = inlined_call_operand.vmem [shape: f32[2,10], index: 4, kind: output, shape index: {0}]   ;;  %s3744_s5 = inlined_call_operand.vmem [shape: f32[4,8,64], index: 5, kind: output, shape index: {1}]  }
   0x1 LB: > { %s2039_s19 = sadd.s32 4294967295, %s2604_s18   ;;  %p2042_p0 = scmp.ge.s32.totalorder %s2604_s18, 1  ;;  %s2604_s18 = sphi %s2641_s18, %s16_s18  }
   0x2   : > { %p175_p1 = scmp.lt.s32.totalorder %s2604_s18, 5 }
   0x4   : > { %p176_p2 = pnand %p2042_p0, %p175_p1 }
   0x5   : > { %p197_p3 = scmp.lt.s32.totalorder (!%p176_p2), %s2039_s19, 3  ;;  %p2044_p4 = scmp.ne.s32.totalorder (!%p176_p2), %s2039_s19, 0 }
   0x6   : > { %179 = sbr.rel (%p176_p2) target bundleno = 761 (0x2f9), region = 36 }
   0xd   : > { %s198_s20 = scalar_select %p197_p3, %s2039_s19, 3 }
   0xe   : > { %204 = sbr.rel (%p2044_p4) target bundleno = 33 (0x21), region = 40  ;;  %vm205_vm0 = vcmask (!%p2044_p4), 392192   ;;  %vm207_vm1 = vcmask (!%p2044_p4), 388096   ;;  %vm241_vm2 = vcmask (!%p2044_p4), 74752   ;;  %v2606_v0 = vmov (!%p2044_p4), 0.0  }
   0xf   : > { %s2043_s21 = sshll.u32 %s198_s20, 3  ;;  %206 = vst.msk [vmem:[#allocation2] sm:$0xff] (!%p2044_p4), %vm205_vm0, %v2606_v0  ;;  %209 = vst.msk [vmem:[#allocation2 + $0x10] sm:$0xff] (!%p2044_p4), %vm205_vm0, %v2606_v0 }
  0x10   : > { %s2652_s24 = scalar_lea.vmem %s3744_s5, %s2043_s21  ;;  %211 = vst.msk [vmem:[#allocation2 + $0x20] sm:$0xff] (!%p2044_p4), %vm205_vm0, %v2606_v0  ;;  %213 = vst.msk [vmem:[#allocation2 + $0x30] sm:$0xff] (!%p2044_p4), %vm205_vm0, %v2606_v0 }
  0x11   : > { %215 = vst.msk [vmem:[#allocation2 + $0x40] sm:$0xff] (!%p2044_p4), %vm205_vm0, %v2606_v0  ;;  %217 = vst.msk [vmem:[#allocation2 + $0x50] sm:$0xff] (!%p2044_p4), %vm205_vm0, %v2606_v0 }
  0x12   : > { %219 = vst.msk [vmem:[#allocation2 + $0x60] sm:$0xff] (!%p2044_p4), %vm205_vm0, %v2606_v0  ;;  %221 = vst.msk [vmem:[#allocation2 + $0x70] sm:$0xff] (!%p2044_p4), %vm205_vm0, %v2606_v0 }
  0x13   : > { %223 = vst.msk [vmem:[#allocation2 + $0x80] sm:$0xff] (!%p2044_p4), %vm205_vm0, %v2606_v0  ;;  %225 = vst.msk [vmem:[#allocation2 + $0x90] sm:$0xff] (!%p2044_p4), %vm205_vm0, %v2606_v0 }
  0x14   : > { %227 = vst.msk [vmem:[#allocation2 + $0xa0] sm:$0xff] (!%p2044_p4), %vm205_vm0, %v2606_v0  ;;  %229 = vst.msk [vmem:[#allocation2 + $0xb0] sm:$0xff] (!%p2044_p4), %vm205_vm0, %v2606_v0 }
  0x15   : > { %231 = vst.msk [vmem:[#allocation2 + $0xc0] sm:$0xff] %vm205_vm0, %v2606_v0  ;;  %233 = vst.msk [vmem:[#allocation2 + $0xd0] sm:$0xff] %vm205_vm0, %v2606_v0 }
  0x16   : > { %235 = vst.msk [vmem:[#allocation2 + $0xe0] sm:$0xff] %vm205_vm0, %v2606_v0  ;;  %237 = vst.msk [vmem:[#allocation2 + $0xf0] sm:$0xff] %vm205_vm0, %v2606_v0 }
  0x17   : > { %239 = vst [vmem:[#allocation3] sm:$0xff] %v2606_v0  ;;  %240 = vst [vmem:[#allocation3 + $0x8] sm:$0xff] %v2606_v0 }
  0x18   : > { %208 = vst.msk [vmem:[#allocation2 + $0x8] sm:$0xf] %vm207_vm1, %v2606_v0  ;;  %210 = vst.msk [vmem:[#allocation2 + $0x18] sm:$0xf] %vm207_vm1, %v2606_v0 }
  0x19   : > { %212 = vst.msk [vmem:[#allocation2 + $0x28] sm:$0xf] %vm207_vm1, %v2606_v0  ;;  %214 = vst.msk [vmem:[#allocation2 + $0x38] sm:$0xf] %vm207_vm1, %v2606_v0 }
  0x1a   : > { %216 = vst.msk [vmem:[#allocation2 + $0x48] sm:$0xf] %vm207_vm1, %v2606_v0  ;;  %218 = vst.msk [vmem:[#allocation2 + $0x58] sm:$0xf] %vm207_vm1, %v2606_v0 }
  0x1b   : > { %220 = vst.msk [vmem:[#allocation2 + $0x68] sm:$0xf] %vm207_vm1, %v2606_v0  ;;  %222 = vst.msk [vmem:[#allocation2 + $0x78] sm:$0xf] %vm207_vm1, %v2606_v0 }
  0x1c   : > { %224 = vst.msk [vmem:[#allocation2 + $0x88] sm:$0xf] %vm207_vm1, %v2606_v0  ;;  %226 = vst.msk [vmem:[#allocation2 + $0x98] sm:$0xf] %vm207_vm1, %v2606_v0 }
  0x1d   : > { %228 = vst.msk [vmem:[#allocation2 + $0xa8] sm:$0xf] %vm207_vm1, %v2606_v0  ;;  %230 = vst.msk [vmem:[#allocation2 + $0xb8] sm:$0xf] %vm207_vm1, %v2606_v0 }
  0x1e   : > { %232 = vst.msk [vmem:[#allocation2 + $0xc8] sm:$0xf] %vm207_vm1, %v2606_v0  ;;  %234 = vst.msk [vmem:[#allocation2 + $0xd8] sm:$0xf] %vm207_vm1, %v2606_v0 }
  0x1f   : > { %236 = vst.msk [vmem:[#allocation2 + $0xe8] sm:$0xf] %vm207_vm1, %v2606_v0  ;;  %238 = vst.msk [vmem:[#allocation2 + $0xf8] sm:$0xf] %vm207_vm1, %v2606_v0 }
  0x20   : > { %242 = vst.msk [vmem:[#allocation4] sm:$0x3] %vm241_vm2, %v2606_v0  ;;  %243 = vst.msk [vmem:[%s3743_s4] sm:$0x3] %vm241_vm2, %v2606_v0 }
  0x21 PF: > { %v2105_v1 = vld [vmem:[%s3741_s2 + $0x128] sm:$0xff]  ;;  %v2107_v2 = vld [vmem:[%s3741_s2 + $0x138] sm:$0xff]  ;;  %v2104_v3 = vld [vmem:[%s3741_s2 + $0x120] sm:$0xff]  ;;  %v2607_v8 = vmov 0.0   ;;  %vm468_vm3 = vcmask 392192   ;;  %vm470_vm9 = vcmask 388096  }
  0x22   : > { %v2402_v4 = vpack.c.bf16 %v2107_v2, %v2105_v1  ;;  %v2106_v5 = vld [vmem:[%s3741_s2 + $0x130] sm:$0xff]  ;;  %v2109_v6 = vld [vmem:[%s3741_s2 + $0x148] sm:$0xff]  ;;  %v2111_v7 = vld [vmem:[%s3741_s2 + $0x158] sm:$0xff]  ;;  %875 = vmatprep.mubr.f32.mxu0 %v2607_v8  ;;  %623 = vmatprep.mubr.f32.mxu1 %v2607_v8  ;;  %vm553_vm13 = vcmask 1045504   ;;  %vm716_vm2 = vcmask 1043456   ;;  %s2610_s29 = smov 64  }
  0x23   : > { %v2404_v9 = vpack.c.bf16 %v2106_v5, %v2104_v3  ;;  %v2406_v10 = vpack.c.bf16 %v2111_v7, %v2109_v6  ;;  %v2108_v11 = vld [vmem:[%s3741_s2 + $0x140] sm:$0xff]  ;;  %v2110_v12 = vld [vmem:[%s3741_s2 + $0x150] sm:$0xff]  ;;  %v2113_v13 = vld [vmem:[%s3741_s2 + $0x168] sm:$0xff] }
  0x24   : > { %2403 = vmatprep.subr.bf16.mxu0 %v2402_v4  ;;  %v2115_v14 = vld [vmem:[%s3741_s2 + $0x178] sm:$0xff]  ;;  %v2112_v15 = vld [vmem:[%s3741_s2 + $0x160] sm:$0xff]  ;;  %v2114_v16 = vld [vmem:[%s3741_s2 + $0x170] sm:$0xff]  ;;  %v2408_v17 = vpack.c.bf16 %v2110_v12, %v2108_v11 }
  0x25   : > { %2405 = vmatpush1.bf16.msra.mxu0 %v2404_v9  ;;  %v2118_v18 = vld [vmem:[%s3741_s2 + $0x188] sm:$0xff]  ;;  %v2120_v19 = vld [vmem:[%s3741_s2 + $0x198] sm:$0xff]  ;;  %v248_v20 = vld [vmem:[#allocation2 + $0x20] sm:$0xff]  ;;  %v2410_v21 = vpack.c.bf16 %v2115_v14, %v2113_v13  ;;  %v2412_v32 = vpack.c.bf16 %v2114_v16, %v2112_v15 }
  0x26   : > { %2407 = vmatprep.subr.bf16.mxu0 %v2406_v10  ;;  %v250_v22 = vld [vmem:[#allocation2 + $0x30] sm:$0xff]  ;;  %v256_v23 = vld [vmem:[#allocation2 + $0x60] sm:$0xff]  ;;  %v2414_v34 = vpack.c.bf16 %v2120_v19, %v2118_v18  ;;  %v2122_v40 = vld [vmem:[%s3741_s2 + $0x1a8] sm:$0xff] }
  0x27   : > { %v258_v24 = vld [vmem:[#allocation2 + $0x70] sm:$0xff]  ;;  %v280_v25 = vld [vmem:[%s3739_s0 + $0x20] sm:$0xff]  ;;  %v2124_v41 = vld [vmem:[%s3741_s2 + $0x1b8] sm:$0xff] }
  0x28   : > { %v282_v26 = vld [vmem:[%s3739_s0 + $0x30] sm:$0xff]  ;;  %v288_v27 = vld [vmem:[%s3739_s0 + $0x60] sm:$0xff]  ;;  %v312_v29 = vadd.f32 %v280_v25, %v248_v20  ;;  %v2126_v48 = vld [vmem:[%s3741_s2 + $0x1c8] sm:$0xff]  ;;  %v2418_v60 = vpack.c.bf16 %v2124_v41, %v2122_v40 }
  0x29   : > { %v290_v28 = vld [vmem:[%s3739_s0 + $0x70] sm:$0xff]  ;;  %v314_v30 = vadd.f32 %v282_v26, %v250_v22  ;;  %v320_v31 = vadd.f32 %v288_v27, %v256_v23  ;;  %2409 = vmatpush1.bf16.msra.mxu0 %v2408_v17  ;;  %v2117_v35 = vld [vmem:[%s3741_s2 + $0x180] sm:$0xff]  ;;  %v2128_v52 = vld [vmem:[%s3741_s2 + $0x1d8] sm:$0xff] }
  0x2a   : > { %v322_v33 = vadd.f32 %v290_v28, %v258_v24  ;;  %2411 = vmatprep.subr.bf16.mxu0 %v2410_v21  ;;  %vm344_vm4 = vcmp.ge.f32.partialorder %v312_v29, 1.0  ;;  %v2119_v36 = vld [vmem:[%s3741_s2 + $0x190] sm:$0xff]  ;;  %v2121_v46 = vld [vmem:[%s3741_s2 + $0x1a0] sm:$0xff]  ;;  %v249_v53 = vld [vmem:[#allocation2 + $0x28] sm:$0xf]  ;;  %v2422_v5 = vpack.c.bf16 %v2128_v52, %v2126_v48 }
  0x2b   : > { %vm346_vm5 = vcmp.ge.f32.partialorder %v314_v30, 1.0  ;;  %vm352_vm6 = vcmp.ge.f32.partialorder %v320_v31, 1.0  ;;  %v2049_v37 = vsel %vm344_vm4, 1.0, %v2607_v8  ;;  %v440_v43 = vsel %vm344_vm4, 0.0, %v312_v29  ;;  %v2123_v47 = vld [vmem:[%s3741_s2 + $0x1b0] sm:$0xff]  ;;  %v2125_v7 = vld [vmem:[%s3741_s2 + $0x1c0] sm:$0xff] }
  0x2c   : > { %vm354_vm7 = vcmp.ge.f32.partialorder %v322_v33, 1.0  ;;  %v2051_v38 = vsel %vm346_vm5, 1.0, %v2607_v8  ;;  %v2057_v39 = vsel %vm352_vm6, 1.0, %v2607_v8  ;;  %v442_v44 = vsel %vm346_vm5, 0.0, %v314_v30  ;;  %474 = vst.msk [vmem:[#allocation2 + $0x20] sm:$0xff] %vm468_vm3, %v440_v43  ;;  %v2127_v9 = vld [vmem:[%s3741_s2 + $0x1d0] sm:$0xff] }
  0x2d   : > { %v2059_v42 = vsel %vm354_vm7, 1.0, %v2607_v8  ;;  %v448_v45 = vsel %vm352_vm6, 0.0, %v320_v31  ;;  %2413 = vmatpush1.bf16.msra.mxu0 %v2412_v32  ;;  %v450_v49 = vsel %vm354_vm7, 0.0, %v322_v33  ;;  %476 = vst.msk [vmem:[#allocation2 + $0x30] sm:$0xff] %vm468_vm3, %v442_v44  ;;  %v508_v50 = vmax.f32 %v2049_v37, %v2051_v38  ;;  %v251_v54 = vld [vmem:[#allocation2 + $0x38] sm:$0xf] }
  0x2e   : > { %482 = vst.msk [vmem:[#allocation2 + $0x60] sm:$0xff] %vm468_vm3, %v448_v45  ;;  %v510_v51 = vmax.f32 %v2057_v39, %v2059_v42  ;;  %2415 = vmatprep.subr.bf16.mxu0 %v2414_v34  ;;  %484 = vst.msk [vmem:[#allocation2 + $0x70] sm:$0xff] %vm468_vm3, %v450_v49  ;;  %v2416_v55 = vpack.c.bf16 %v2119_v36, %v2117_v35  ;;  %v257_v56 = vld [vmem:[#allocation2 + $0x68] sm:$0xf]  ;;  %v259_v57 = vld [vmem:[#allocation2 + $0x78] sm:$0xf]  ;;  %v2420_v4 = vpack.c.bf16 %v2123_v47, %v2121_v46 }
  0x2f   : > { %v281_v58 = vld [vmem:[%s3739_s0 + $0x28] sm:$0xf]  ;;  %v283_v61 = vld [vmem:[%s3739_s0 + $0x38] sm:$0xf]  ;;  %v2424_v21 = vpack.c.bf16 %v2127_v9, %v2125_v7  ;;  %v2130_v25 = vld [vmem:[%s3741_s2 + $0x1e0] sm:$0xff] }
  0x30   : > { %v2782_v59 = vmax.f32 %v508_v50, %v510_v51  ;;  %v289_v62 = vld [vmem:[%s3739_s0 + $0x68] sm:$0xf]  ;;  %v291_v63 = vld [vmem:[%s3739_s0 + $0x78] sm:$0xf]  ;;  %v313_v0 = vadd.f32 %v281_v58, %v249_v53  ;;  %v315_v1 = vadd.f32 %v283_v61, %v251_v54  ;;  %v2132_v26 = vld [vmem:[%s3741_s2 + $0x1f0] sm:$0xff] }
  0x31   : > { %v321_v2 = vadd.f32 %v289_v62, %v257_v56  ;;  %v323_v3 = vadd.f32 %v291_v63, %v259_v57  ;;  %v2131_v14 = vld [vmem:[%s3741_s2 + $0x1e8] sm:$0xff]  ;;  %v2133_v15 = vld [vmem:[%s3741_s2 + $0x1f8] sm:$0xff]  ;;  %v2841_v32 = vld [vmem:[%s3741_s2 + $0x200] sm:$0xff]  ;;  %v2428_v38 = vpack.c.bf16 %v2132_v26, %v2130_v25 }
  0x32   : > { %2116 = vmatmul.mubr.msk.f32.vlgmr.msra.gmra.mrb[0].mxu0 %vm468_vm3, %v2782_v59  ;;  %vm345_vm8 = vcmp.ge.f32.partialorder %v313_v0, 1.0  ;;  %vm347_vm10 = vcmp.ge.f32.partialorder %v315_v1, 1.0  ;;  %v2426_v22 = vpack.c.bf16 %v2133_v15, %v2131_v14  ;;  %v898_v24 = vrot.slane %v2782_v59, 2  ;;  %v2078_v27 = vld [vmem:[%s3741_s2 + $0x68] sm:$0xff]  ;;  %v2137_v29 = vld [vmem:[%s3741_s2 + $0x218] sm:$0xff]  ;;  %v2846_v33 = vld [vmem:[%s3741_s2 + $0x210] sm:$0xff] }
  0x33   : > { %2417 = vmatpush1.bf16.msra.mxu0 %v2416_v55  ;;  %967 = vmatprep.mubr.f32.mxu0 %v2607_v8  ;;  %vm353_vm11 = vcmp.ge.f32.partialorder %v321_v2, 1.0  ;;  %vm355_vm12 = vcmp.ge.f32.partialorder %v323_v3, 1.0  ;;  %v2050_v6 = vsel %vm345_vm8, 1.0, %v2607_v8  ;;  %v2052_v10 = vsel %vm347_vm10, 1.0, %v2607_v8  ;;  %v2135_v28 = vld [vmem:[%s3741_s2 + $0x208] sm:$0xff]  ;;  %v2080_v30 = vld [vmem:[%s3741_s2 + $0x78] sm:$0xff] }
  0x34   : > { %2419 = vmatprep.subr.bf16.mxu0 %v2418_v60  ;;  %v2058_v11 = vsel %vm353_vm11, 1.0, %v2607_v8  ;;  %v2060_v12 = vsel %vm355_vm12, 1.0, %v2607_v8  ;;  %v441_v13 = vsel %vm345_vm8, 0.0, %v313_v0  ;;  %v443_v16 = vsel %vm347_vm10, 0.0, %v315_v1  ;;  %v2077_v35 = vld [vmem:[%s3741_s2 + $0x60] sm:$0xff]  ;;  %v2079_v36 = vld [vmem:[%s3741_s2 + $0x70] sm:$0xff] }
  0x35   : > { %v449_v17 = vsel %vm353_vm11, 0.0, %v321_v2  ;;  %v451_v18 = vsel %vm355_vm12, 0.0, %v323_v3  ;;  %475 = vst.msk [vmem:[#allocation2 + $0x28] sm:$0xf] %vm470_vm9, %v441_v13  ;;  %v509_v19 = vmax.f32 %v2050_v6, %v2052_v10  ;;  %477 = vst.msk [vmem:[#allocation2 + $0x38] sm:$0xf] %vm470_vm9, %v443_v16  ;;  %v511_v20 = vmax.f32 %v2058_v11, %v2060_v12 }
  0x36   : > { %483 = vst.msk [vmem:[#allocation2 + $0x68] sm:$0xf] %vm470_vm9, %v449_v17  ;;  %485 = vst.msk [vmem:[#allocation2 + $0x78] sm:$0xf] %vm470_vm9, %v451_v18  ;;  %v2366_v34 = vpack.c.bf16 %v2080_v30, %v2078_v27  ;;  %v260_v37 = vld [vmem:[#allocation2 + $0x80] sm:$0xff]  ;;  %v2368_v39 = vpack.c.bf16 %v2079_v36, %v2077_v35  ;;  %v262_v40 = vld [vmem:[#allocation2 + $0x90] sm:$0xff]  ;;  %v2430_v44 = vpack.c.bf16 %v2137_v29, %v2135_v28 }
  0x37   : > { %2421 = vmatpush1.bf16.msra.mxu0 %v2420_v4  ;;  %v2816_v23 = vmax.f32 %v509_v19, %v511_v20  ;;  %v268_v41 = vld [vmem:[#allocation2 + $0xc0] sm:$0xff]  ;;  %v270_v42 = vld [vmem:[#allocation2 + $0xd0] sm:$0xff]  ;;  %v2867_v48 = vld [vmem:[%s3741_s2 + $0x228] sm:$0xff]  ;;  %v2432_v58 = vpack.c.bf16 %v2846_v33, %v2841_v32  ;;  %v989_v27 = vrot.slane %v2782_v59, 4 }
  0x38   : > { %2423 = vmatprep.subr.bf16.mxu0 %v2422_v5  ;;  %2367 = vmatprep.subr.bf16.mxu1 %v2366_v34  ;;  %v292_v45 = vld [vmem:[%s3739_s0 + $0x80] sm:$0xff]  ;;  %v294_v46 = vld [vmem:[%s3739_s0 + $0x90] sm:$0xff]  ;;  %v2872_v49 = vld [vmem:[%s3741_s2 + $0x238] sm:$0xff] }
  0x39   : > { %v899_v31 = vrot.slane %v2816_v23, 2  ;;  %v300_v47 = vld [vmem:[%s3739_s0 + $0xc0] sm:$0xff]  ;;  %2369 = vmatpush1.bf16.msra.mxu1 %v2368_v39  ;;  %v302_v50 = vld [vmem:[%s3739_s0 + $0xd0] sm:$0xff]  ;;  %v2877_v51 = vadd.f32 %v292_v45, %v260_v37  ;;  %v2879_v52 = vadd.f32 %v294_v46, %v262_v40  ;;  %v2082_v56 = vld [vmem:[%s3741_s2 + $0x88] sm:$0xff]  ;;  %v2434_v0 = vpack.c.bf16 %v2872_v49, %v2867_v48 }
  0x3a   : > { %v2881_v53 = vadd.f32 %v300_v47, %v268_v41  ;;  %v2887_v54 = vld [vmem:[%s3741_s2 + $0x220] sm:$0xff]  ;;  %v2889_v55 = vadd.f32 %v302_v50, %v270_v42  ;;  %v2084_v57 = vld [vmem:[%s3741_s2 + $0x98] sm:$0xff]  ;;  %v2902_v60 = vld [vmem:[%s3741_s2 + $0x230] sm:$0xff]  ;;  %v990_v28 = vrot.slane %v2816_v23, 4 }
  0x3b   : > { %2425 = vmatpush1.bf16.msra.mxu0 %v2424_v21  ;;  %v900_v43 = vsel %vm553_vm13, %v898_v24, %v899_v31  ;;  %v2908_v61 = vld [vmem:[%s3741_s2 + $0x248] sm:$0xff]  ;;  %v2913_v62 = vld [vmem:[%s3741_s2 + $0x258] sm:$0xff]  ;;  %v2370_v63 = vpack.c.bf16 %v2084_v57, %v2082_v56  ;;  %v2920_v1 = vld [vmem:[%s3741_s2 + $0x240] sm:$0xff]  ;;  %vm356_vm14 = vcmp.ge.f32.partialorder %v2877_v51, 1.0  ;;  %vm358_vm15 = vcmp.ge.f32.partialorder %v2879_v52, 1.0 }
  0x3c   : > { %2427 = vmatprep.subr.bf16.mxu0 %v2426_v22  ;;  %v2925_v2 = vld [vmem:[%s3741_s2 + $0x250] sm:$0xff]  ;;  %vm364_vm0 = vcmp.ge.f32.partialorder %v2881_v53, 1.0  ;;  %v2081_v3 = vld [vmem:[%s3741_s2 + $0x80] sm:$0xff]  ;;  %v2939_v5 = vld [vmem:[%s3741_s2 + $0x268] sm:$0xff]  ;;  %vm366_vm1 = vcmp.ge.f32.partialorder %v2889_v55, 1.0  ;;  %v452_v12 = vsel %vm356_vm14, 0.0, %v2877_v51  ;;  %v2436_v17 = vpack.c.bf16 %v2902_v60, %v2887_v54 }
  0x3d   : > { %v2083_v4 = vld [vmem:[%s3741_s2 + $0x90] sm:$0xff]  ;;  %v2944_v6 = vld [vmem:[%s3741_s2 + $0x278] sm:$0xff]  ;;  %v2949_v7 = vld [vmem:[%s3741_s2 + $0x260] sm:$0xff]  ;;  %v454_v13 = vsel %vm358_vm15, 0.0, %v2879_v52  ;;  %v460_v14 = vsel %vm364_vm0, 0.0, %v2881_v53  ;;  %2371 = vmatprep.subr.bf16.mxu1 %v2370_v63  ;;  %v462_v22 = vsel %vm366_vm1, 0.0, %v2889_v55  ;;  %v2438_v34 = vpack.c.bf16 %v2913_v62, %v2908_v61 }
  0x3e   : > { %2129 = vmatmul.mubr.msk.f32.vlgmr.msra.gmra.mrb[0].mxu0 %vm468_vm3, %v900_v43  ;;  %v2954_v9 = vld [vmem:[%s3741_s2 + $0x270] sm:$0xff]  ;;  %v2959_v10 = vld [vmem:[%s3741_s2 + $0x288] sm:$0xff]  ;;  %v2964_v11 = vld [vmem:[%s3741_s2 + $0x298] sm:$0xff]  ;;  %486 = vst.msk [vmem:[#allocation2 + $0x80] sm:$0xff] %vm468_vm3, %v452_v12  ;;  %v2372_v31 = vpack.c.bf16 %v2083_v4, %v2081_v3  ;;  %v3054_v35 = vsel %vm356_vm14, 1.0, %v2607_v8  ;;  %v3059_v36 = vsel %vm358_vm15, 1.0, %v2607_v8  ;;  %v2440_v40 = vpack.c.bf16 %v2925_v2, %v2920_v1 }
  0x3f   : > { %2429 = vmatpush1.bf16.msra.mxu0 %v2428_v38  ;;  %1058 = vmatprep.mubr.f32.mxu0 %v2607_v8  ;;  %v2086_v15 = vld [vmem:[%s3741_s2 + $0xa8] sm:$0xff]  ;;  %v2088_v16 = vld [vmem:[%s3741_s2 + $0xb8] sm:$0xff]  ;;  %v2987_v18 = vld [vmem:[%s3741_s2 + $0x280] sm:$0xff]  ;;  %488 = vst.msk [vmem:[#allocation2 + $0x90] sm:$0xff] %vm468_vm3, %v454_v13  ;;  %v3077_v41 = vsel %vm364_vm0, 1.0, %v2607_v8  ;;  %v3082_v42 = vsel %vm366_vm1, 1.0, %v2607_v8  ;;  %v2442_v47 = vpack.c.bf16 %v2944_v6, %v2939_v5  ;;  %v2444_v48 = vpack.c.bf16 %v2954_v9, %v2949_v7 }
  0x40   : > { %2431 = vmatprep.subr.bf16.mxu0 %v2430_v44  ;;  %v2992_v19 = vld [vmem:[%s3741_s2 + $0x290] sm:$0xff]  ;;  %v2997_v20 = vld [vmem:[%s3741_s2 + $0x2a8] sm:$0xff]  ;;  %v3002_v21 = vld [vmem:[%s3741_s2 + $0x2b8] sm:$0xff]  ;;  %494 = vst.msk [vmem:[#allocation2 + $0xc0] sm:$0xff] %vm468_vm3, %v460_v14  ;;  %v2374_v23 = vpack.c.bf16 %v2088_v16, %v2086_v15  ;;  %2373 = vmatpush1.bf16.msra.mxu1 %v2372_v31  ;;  %v2446_v49 = vpack.c.bf16 %v2964_v11, %v2959_v10 }
  0x41   : > { %v3013_v24 = vld [vmem:[%s3741_s2 + $0x2a0] sm:$0xff]  ;;  %v3018_v25 = vld [vmem:[%s3741_s2 + $0x2b0] sm:$0xff]  ;;  %496 = vst.msk [vmem:[#allocation2 + $0xd0] sm:$0xff] %vm468_vm3, %v462_v22  ;;  %v3029_v29 = vld [vmem:[%s3741_s2 + $0x2c8] sm:$0xff]  ;;  %v991_v54 = vsel %vm716_vm2, %v989_v27, %v990_v28  ;;  %v2448_v55 = vpack.c.bf16 %v2992_v19, %v2987_v18  ;;  %v2450_v56 = vpack.c.bf16 %v3002_v21, %v2997_v20  ;;  %v514_v62 = vmax.f32 %v3054_v35, %v3059_v36 }
  0x42   : > { %v2085_v26 = vld [vmem:[%s3741_s2 + $0xa0] sm:$0xff]  ;;  %v3034_v30 = vld [vmem:[%s3741_s2 + $0x2d8] sm:$0xff]  ;;  %v3044_v59 = vld [vmem:[%s3741_s2 + $0x2d0] sm:$0xff]  ;;  %2375 = vmatprep.subr.bf16.mxu1 %v2374_v23  ;;  %v2452_v57 = vpack.c.bf16 %v3018_v25, %v3013_v24  ;;  %v516_v63 = vmax.f32 %v3077_v41, %v3082_v42 }
  0x43   : > { %2433 = vmatpush1.bf16.msra.mxu0 %v2432_v58  ;;  %v3039_v32 = vld [vmem:[%s3741_s2 + $0x2c0] sm:$0xff]  ;;  %v2087_v33 = vld [vmem:[%s3741_s2 + $0xb0] sm:$0xff]  ;;  %v3064_v37 = vld [vmem:[%s3741_s2 + $0x2e8] sm:$0xff] }
  0x44   : > { %2435 = vmatprep.subr.bf16.mxu0 %v2434_v0  ;;  %v527_v38 = vld [vmem:[%s3741_s2 + $0x8] sm:$0xff]  ;;  %v529_v39 = vld [vmem:[%s3741_s2 + $0x18] sm:$0xff]  ;;  %v2376_v44 = vpack.c.bf16 %v2087_v33, %v2085_v26  ;;  %v244_v45 = vld [vmem:[#allocation2] sm:$0xff]  ;;  %v2454_v0 = vpack.c.bf16 %v3034_v30, %v3029_v29  ;;  %v2456_v1 = vpack.c.bf16 %v3044_v59, %v3039_v32 }
  0x45   : > { %v3087_v43 = vld [vmem:[%s3741_s2 + $0x2f8] sm:$0xff]  ;;  %v245_v46 = vld [vmem:[#allocation2 + $0x8] sm:$0xf]  ;;  %v2378_v50 = vpack.c.bf16 %v529_v39, %v527_v38  ;;  %v246_v51 = vld [vmem:[#allocation2 + $0x10] sm:$0xff] }
  0x46   : > { %v247_v52 = vld [vmem:[#allocation2 + $0x18] sm:$0xf]  ;;  %v252_v53 = vld [vmem:[#allocation2 + $0x40] sm:$0xff]  ;;  %v253_v58 = vld [vmem:[#allocation2 + $0x48] sm:$0xf]  ;;  %v2458_v5 = vpack.c.bf16 %v3087_v43, %v3064_v37  ;;  %2377 = vmatpush1.bf16.msra.mxu1 %v2376_v44 }
  0x47   : > { %2437 = vmatpush1.bf16.msra.mxu0 %v2436_v17  ;;  %v254_v60 = vld [vmem:[#allocation2 + $0x50] sm:$0xff]  ;;  %v255_v61 = vld [vmem:[#allocation2 + $0x58] sm:$0xf]  ;;  %v276_v2 = vld [vmem:[%s3739_s0] sm:$0xff]  ;;  %2379 = vmatprep.subr.bf16.mxu1 %v2378_v50 }
  0x48   : > { %2439 = vmatprep.subr.bf16.mxu0 %v2438_v34  ;;  %v277_v3 = vld [vmem:[%s3739_s0 + $0x8] sm:$0xf]  ;;  %v278_v4 = vld [vmem:[%s3739_s0 + $0x10] sm:$0xff]  ;;  %v279_v6 = vld [vmem:[%s3739_s0 + $0x18] sm:$0xf]  ;;  %v308_v12 = vadd.f32 %v276_v2, %v244_v45 }
  0x49   : > { %v284_v7 = vld [vmem:[%s3739_s0 + $0x40] sm:$0xff]  ;;  %v285_v9 = vld [vmem:[%s3739_s0 + $0x48] sm:$0xf]  ;;  %v309_v13 = vadd.f32 %v277_v3, %v245_v46  ;;  %v310_v14 = vadd.f32 %v278_v4, %v246_v51  ;;  %v286_v15 = vld [vmem:[%s3739_s0 + $0x50] sm:$0xff]  ;;  %v311_v17 = vadd.f32 %v279_v6, %v247_v52 }
  0x4a   : > { %2142 = vmatmul.mubr.msk.f32.vlgmr.msra.gmra.mrb[0].mxu0 %vm468_vm3, %v991_v54  ;;  %v287_v16 = vld [vmem:[%s3739_s0 + $0x58] sm:$0xf]  ;;  %v316_v22 = vadd.f32 %v284_v7, %v252_v53  ;;  %v317_v26 = vadd.f32 %v285_v9, %v253_v58  ;;  %v318_v27 = vadd.f32 %v286_v15, %v254_v60  ;;  %vm340_vm4 = vcmp.ge.f32.partialorder %v308_v12, 1.0  ;;  %v261_v33 = vld [vmem:[#allocation2 + $0x88] sm:$0xf]  ;;  %v3153_v44 = vld [vmem:[%s3741_s2] sm:$0xff] }
  0x4b   : > { %2441 = vmatpush1.bf16.msra.mxu0 %v2440_v40  ;;  %1147 = vmatprep.mubr.f32.mxu0 %v2607_v8  ;;  %v319_v28 = vadd.f32 %v287_v16, %v255_v61  ;;  %vm341_vm5 = vcmp.ge.f32.partialorder %v309_v13, 1.0  ;;  %vm342_vm6 = vcmp.ge.f32.partialorder %v310_v14, 1.0  ;;  %vm343_vm7 = vcmp.ge.f32.partialorder %v311_v17, 1.0  ;;  %v3158_v45 = vld [vmem:[%s3741_s2 + $0x10] sm:$0xff]  ;;  %v263_v46 = vld [vmem:[#allocation2 + $0x98] sm:$0xf] }
  0x4c   : > { %2443 = vmatprep.subr.bf16.mxu0 %v2442_v47  ;;  %vm348_vm8 = vcmp.ge.f32.partialorder %v316_v22, 1.0  ;;  %vm349_vm10 = vcmp.ge.f32.partialorder %v317_v26, 1.0  ;;  %vm350_vm11 = vcmp.ge.f32.partialorder %v318_v27, 1.0  ;;  %v2045_v31 = vsel %vm340_vm4, 1.0, %v2607_v8  ;;  %v269_v47 = vld [vmem:[#allocation2 + $0xc8] sm:$0xf] }
  0x4d   : > { %vm351_vm12 = vcmp.ge.f32.partialorder %v319_v28, 1.0  ;;  %v2046_v23 = vsel %vm341_vm5, 1.0, %v2607_v8  ;;  %v2047_v34 = vsel %vm342_vm6, 1.0, %v2607_v8  ;;  %v2048_v38 = vsel %vm343_vm7, 1.0, %v2607_v8  ;;  %v271_v50 = vld [vmem:[#allocation2 + $0xd8] sm:$0xf] }
  0x4e   : > { %v2053_v39 = vsel %vm348_vm8, 1.0, %v2607_v8  ;;  %v2054_v40 = vsel %vm349_vm10, 1.0, %v2607_v8  ;;  %v2055_v51 = vsel %vm350_vm11, 1.0, %v2607_v8  ;;  %v2056_v52 = vsel %vm351_vm12, 1.0, %v2607_v8  ;;  %v293_v58 = vld [vmem:[%s3739_s0 + $0x88] sm:$0xf] }
  0x4f   : > { %2445 = vmatpush1.bf16.msra.mxu0 %v2444_v48  ;;  %v436_v53 = vsel %vm340_vm4, 0.0, %v308_v12  ;;  %v437_v54 = vsel %vm341_vm5, 0.0, %v309_v13  ;;  %v438_v48 = vsel %vm342_vm6, 0.0, %v310_v14  ;;  %v439_v60 = vsel %vm343_vm7, 0.0, %v311_v17  ;;  %v295_v3 = vld [vmem:[%s3739_s0 + $0x98] sm:$0xf] }
  0x50   : > { %2447 = vmatprep.subr.bf16.mxu0 %v2446_v49  ;;  %v444_v61 = vsel %vm348_vm8, 0.0, %v316_v22  ;;  %v445_v2 = vsel %vm349_vm10, 0.0, %v317_v26  ;;  %469 = vst.msk [vmem:[#allocation2] sm:$0xff] %vm468_vm3, %v436_v53  ;;  %v446_v4 = vsel %vm350_vm11, 0.0, %v318_v27  ;;  %v447_v10 = vsel %vm351_vm12, 0.0, %v319_v28  ;;  %472 = vst.msk [vmem:[#allocation2 + $0x10] sm:$0xff] %vm468_vm3, %v438_v48 }
  0x51   : > { %471 = vst.msk [vmem:[#allocation2 + $0x8] sm:$0xf] %vm470_vm9, %v437_v54  ;;  %473 = vst.msk [vmem:[#allocation2 + $0x18] sm:$0xf] %vm470_vm9, %v439_v60  ;;  %v502_v11 = vmax.f32 %v2045_v31, %v2047_v34  ;;  %v503_v49 = vmax.f32 %v2046_v23, %v2048_v38  ;;  %v301_v6 = vld [vmem:[%s3739_s0 + $0xc8] sm:$0xf]  ;;  %v3199_v9 = vmax.f32 %v514_v62, %v516_v63 }
  0x52   : > { %478 = vst.msk [vmem:[#allocation2 + $0x40] sm:$0xff] %vm468_vm3, %v444_v61  ;;  %v303_v7 = vld [vmem:[%s3739_s0 + $0xd8] sm:$0xf]  ;;  %480 = vst.msk [vmem:[#allocation2 + $0x50] sm:$0xff] %vm468_vm3, %v446_v4  ;;  %v504_v12 = vmax.f32 %v2053_v39, %v2055_v51  ;;  %v505_v13 = vmax.f32 %v2054_v40, %v2056_v52  ;;  %v325_v14 = vadd.f32 %v293_v58, %v261_v33  ;;  %v531_v15 = vld [vmem:[%s3741_s2 + $0x28] sm:$0xff] }
  0x53   : > { %479 = vst.msk [vmem:[#allocation2 + $0x48] sm:$0xf] %vm470_vm9, %v445_v2  ;;  %481 = vst.msk [vmem:[#allocation2 + $0x58] sm:$0xf] %vm470_vm9, %v447_v10  ;;  %v533_v41 = vld [vmem:[%s3741_s2 + $0x38] sm:$0xff]  ;;  %2449 = vmatpush1.bf16.msra.mxu0 %v2448_v55  ;;  %v2380_v35 = vpack.c.bf16 %v3158_v45, %v3153_v44  ;;  %v327_v36 = vadd.f32 %v295_v3, %v263_v46  ;;  %v333_v42 = vadd.f32 %v301_v6, %v269_v47  ;;  %v2164_v19 = vld [vmem:[%s3741_s2 + $0x2e0] sm:$0xff] }
  0x54   : > { %v335_v62 = vadd.f32 %v303_v7, %v271_v50  ;;  %2451 = vmatprep.subr.bf16.mxu0 %v2450_v56  ;;  %v3217_v63 = vmax.f32 %v502_v11, %v504_v12  ;;  %v3219_v16 = vmax.f32 %v503_v49, %v505_v13  ;;  %vm357_vm14 = vcmp.ge.f32.partialorder %v325_v14, 1.0  ;;  %v530_v31 = vld [vmem:[%s3741_s2 + $0x20] sm:$0xff]  ;;  %v532_v23 = vld [vmem:[%s3741_s2 + $0x30] sm:$0xff]  ;;  %v535_v29 = vld [vmem:[%s3741_s2 + $0x48] sm:$0xff] }
  0x55   : > { %v2382_v17 = vpack.c.bf16 %v533_v41, %v531_v15  ;;  %vm359_vm15 = vcmp.ge.f32.partialorder %v327_v36, 1.0  ;;  %vm365_vm0 = vcmp.ge.f32.partialorder %v333_v42, 1.0  ;;  %v2062_v18 = vsel %vm357_vm14, 1.0, %v2607_v8  ;;  %v2166_v24 = vld [vmem:[%s3741_s2 + $0x2f0] sm:$0xff]  ;;  %v537_v30 = vld [vmem:[%s3741_s2 + $0x58] sm:$0xff]  ;;  %v2169_v46 = vld [vmem:[%s3741_s2 + $0x300] sm:$0xff] }
  0x56   : > { %vm367_vm1 = vcmp.ge.f32.partialorder %v335_v62, 1.0  ;;  %2155 = vmatmul.mubr.msk.f32.vlgmr.msra.gmra.mrb[0].mxu0 %vm468_vm3, %v3199_v9  ;;  %v554_v20 = vrot.slane %v3217_v63, 2  ;;  %v555_v21 = vrot.slane %v3219_v16, 2  ;;  %v2064_v55 = vsel %vm359_vm15, 1.0, %v2607_v8  ;;  %v2172_v38 = vld [vmem:[%s3741_s2 + $0x318] sm:$0xff]  ;;  %v534_v50 = vld [vmem:[%s3741_s2 + $0x40] sm:$0xff] }
  0x57   : > { %v2070_v56 = vsel %vm365_vm0, 1.0, %v2607_v8  ;;  %2453 = vmatpush1.bf16.msra.mxu0 %v2452_v57  ;;  %1239 = vmatprep.mubr.f32.mxu0 %v2607_v8  ;;  %v2072_v22 = vsel %vm367_vm1, 1.0, %v2607_v8  ;;  %v453_v26 = vsel %vm357_vm14, 0.0, %v325_v14  ;;  %v455_v27 = vsel %vm359_vm15, 0.0, %v327_v36  ;;  %v536_v51 = vld [vmem:[%s3741_s2 + $0x50] sm:$0xff]  ;;  %v2092_v52 = vld [vmem:[%s3741_s2 + $0xc8] sm:$0xff] }
  0x58   : > { %v461_v28 = vsel %vm365_vm0, 0.0, %v333_v42  ;;  %2455 = vmatprep.subr.bf16.mxu0 %v2454_v0  ;;  %v556_v25 = vsel %vm553_vm13, %v554_v20, %v555_v21  ;;  %v463_v57 = vsel %vm367_vm1, 0.0, %v335_v62  ;;  %487 = vst.msk [vmem:[#allocation2 + $0x88] sm:$0xf] %vm470_vm9, %v453_v26  ;;  %489 = vst.msk [vmem:[#allocation2 + $0x98] sm:$0xf] %vm470_vm9, %v455_v27  ;;  %v515_v33 = vmax.f32 %v2062_v18, %v2064_v55 }
  0x59   : > { %495 = vst.msk [vmem:[#allocation2 + $0xc8] sm:$0xf] %vm470_vm9, %v461_v28  ;;  %v517_v34 = vmax.f32 %v2070_v56, %v2072_v22  ;;  %v2170_v0 = vld [vmem:[%s3741_s2 + $0x308] sm:$0xff]  ;;  %2089 = vmatmul.mubr.msk.f32.vlgmr.msra.gmra.mrb[0].mxu1 %vm468_vm3, %v556_v25  ;;  %497 = vst.msk [vmem:[#allocation2 + $0xd8] sm:$0xf] %vm470_vm9, %v463_v57  ;;  %v2384_v40 = vpack.c.bf16 %v532_v23, %v530_v31  ;;  %v2460_v44 = vpack.c.bf16 %v2166_v24, %v2164_v19  ;;  %v2094_v53 = vld [vmem:[%s3741_s2 + $0xd8] sm:$0xff] }
  0x5a   : > { %2381 = vmatpush1.bf16.msra.mxu1 %v2380_v35  ;;  %v1170_v45 = vrot.slane %v3199_v9, 2  ;;  %v2386_v47 = vpack.c.bf16 %v537_v30, %v535_v29  ;;  %v2462_v32 = vpack.c.bf16 %v2172_v38, %v2170_v0  ;;  %696 = vmatprep.mubr.f32.mxu1 %v2607_v8  ;;  %v2174_v37 = vld [vmem:[%s3741_s2 + $0x328] sm:$0xff]  ;;  %v2176_v43 = vld [vmem:[%s3741_s2 + $0x338] sm:$0xff]  ;;  %v2175_v54 = vld [vmem:[%s3741_s2 + $0x330] sm:$0xff]  ;;  %v2388_v48 = vpack.c.bf16 %v536_v51, %v534_v50 }
  0x5b   : > { %v3268_v39 = vmax.f32 %v515_v33, %v517_v34  ;;  %2457 = vmatpush1.bf16.msra.mxu0 %v2456_v1  ;;  %2383 = vmatprep.subr.bf16.mxu1 %v2382_v17  ;;  %v2171_v1 = vld [vmem:[%s3741_s2 + $0x310] sm:$0xff]  ;;  %v3312_v58 = vld [vmem:[%s3741_s2 + $0x348] sm:$0xff]  ;;  %v2180_v2 = vld [vmem:[%s3741_s2 + $0x358] sm:$0xff]  ;;  %v2390_v3 = vpack.c.bf16 %v2094_v53, %v2092_v52  ;;  %v2466_v11 = vpack.c.bf16 %v2176_v43, %v2174_v37  ;;  %v1261_v33 = vrot.slane %v3199_v9, 4 }
  0x5c   : > { %2459 = vmatprep.subr.bf16.mxu0 %v2458_v5  ;;  %v2173_v5 = vld [vmem:[%s3741_s2 + $0x320] sm:$0xff]  ;;  %v2464_v61 = vpack.c.bf16 %v2171_v1, %v2169_v46  ;;  %v2093_v10 = vld [vmem:[%s3741_s2 + $0xd0] sm:$0xff]  ;;  %v3337_v7 = vld [vmem:[%s3741_s2 + $0x368] sm:$0xff]  ;;  %v2470_v55 = vpack.c.bf16 %v2180_v2, %v3312_v58  ;;  %v717_v34 = vrot.slane %v3217_v63, 4  ;;  %v718_v50 = vrot.slane %v3219_v16, 4 }
  0x5d   : > { %v1171_v59 = vrot.slane %v3268_v39, 2  ;;  %v2091_v4 = vld [vmem:[%s3741_s2 + $0xc0] sm:$0xff]  ;;  %v3332_v6 = vld [vmem:[%s3741_s2 + $0x350] sm:$0xff]  ;;  %v3342_v12 = vld [vmem:[%s3741_s2 + $0x378] sm:$0xff]  ;;  %v2468_v17 = vpack.c.bf16 %v2175_v54, %v2173_v5  ;;  %v1262_v29 = vrot.slane %v3268_v39, 4  ;;  %vm1985_vm14 = vcmask 74752  }
  0x5e   : > { %2385 = vmatpush1.bf16.msra.mxu1 %v2384_v40  ;;  %v3327_v49 = vld [vmem:[%s3741_s2 + $0x340] sm:$0xff]  ;;  %v2096_v13 = vld [vmem:[%s3741_s2 + $0xe8] sm:$0xff]  ;;  %v2098_v14 = vld [vmem:[%s3741_s2 + $0xf8] sm:$0xff]  ;;  %v2392_v18 = vpack.c.bf16 %v2093_v10, %v2091_v4  ;;  %v2474_v57 = vpack.c.bf16 %v3342_v12, %v3337_v7  ;;  %v719_v7 = vsel %vm716_vm2, %v717_v34, %v718_v50 }
  0x5f   : > { %2461 = vmatpush1.bf16.msra.mxu0 %v2460_v44  ;;  %v1172_v60 = vsel %vm553_vm13, %v1170_v45, %v1171_v59  ;;  %2387 = vmatprep.subr.bf16.mxu1 %v2386_v47  ;;  %v3353_v15 = vld [vmem:[%s3741_s2 + $0xe0] sm:$0xff]  ;;  %v3358_v41 = vld [vmem:[%s3741_s2 + $0xf0] sm:$0xff]  ;;  %v3363_v35 = vld [vmem:[%s3741_s2 + $0x108] sm:$0xff]  ;;  %v2394_v56 = vpack.c.bf16 %v2098_v14, %v2096_v13  ;;  %v2472_v25 = vpack.c.bf16 %v3332_v6, %v3327_v49 }
  0x60   : > { %2463 = vmatprep.subr.bf16.mxu0 %v2462_v32  ;;  %v3368_v36 = vld [vmem:[%s3741_s2 + $0x118] sm:$0xff]  ;;  %v264_v42 = vld [vmem:[#allocation2 + $0xa0] sm:$0xff]  ;;  %v266_v62 = vld [vmem:[#allocation2 + $0xb0] sm:$0xff]  ;;  %v2396_v38 = vpack.c.bf16 %v3358_v41, %v3353_v15  ;;  %v1263_v58 = vsel %vm716_vm2, %v1261_v33, %v1262_v29 }
  0x61   : > { %v272_v19 = vld [vmem:[#allocation2 + $0xe0] sm:$0xff]  ;;  %v274_v20 = vld [vmem:[#allocation2 + $0xf0] sm:$0xff]  ;;  %v2398_v40 = vpack.c.bf16 %v3368_v36, %v3363_v35  ;;  %v2187_v9 = vld [vmem:[%s3741_s2 + $0x388] sm:$0xff] }
  0x62   : > { %2168 = vmatmul.mubr.msk.f32.vlgmr.msra.gmra.mrb[0].mxu0 %vm468_vm3, %v1172_v60  ;;  %2389 = vmatpush1.bf16.msra.mxu1 %v2388_v48  ;;  %v296_v21 = vld [vmem:[%s3739_s0 + $0xa0] sm:$0xff]  ;;  %v298_v22 = vld [vmem:[%s3739_s0 + $0xb0] sm:$0xff]  ;;  %v265_v16 = vld [vmem:[#allocation2 + $0xa8] sm:$0xf] }
  0x63   : > { %2465 = vmatpush1.bf16.msra.mxu0 %v2464_v61  ;;  %2391 = vmatprep.subr.bf16.mxu1 %v2390_v3  ;;  %v304_v26 = vld [vmem:[%s3739_s0 + $0xe0] sm:$0xff]  ;;  %v306_v27 = vld [vmem:[%s3739_s0 + $0xf0] sm:$0xff]  ;;  %v3384_v28 = vadd.f32 %v296_v21, %v264_v42  ;;  %v3387_v31 = vadd.f32 %v298_v22, %v266_v62  ;;  %v267_v1 = vld [vmem:[#allocation2 + $0xb8] sm:$0xf] }
  0x64   : > { %2467 = vmatprep.subr.bf16.mxu0 %v2466_v11  ;;  %1330 = vmatprep.mubr.f32.mxu0 %v2607_v8  ;;  %v3389_v23 = vadd.f32 %v304_v26, %v272_v19  ;;  %v3391_v24 = vadd.f32 %v306_v27, %v274_v20  ;;  %v2182_v30 = vld [vmem:[%s3741_s2 + $0x360] sm:$0xff]  ;;  %v2184_v0 = vld [vmem:[%s3741_s2 + $0x370] sm:$0xff]  ;;  %v273_v52 = vld [vmem:[#allocation2 + $0xe8] sm:$0xf] }
  0x65   : > { %2090 = vmatmul.mubr.msk.f32.vlgmr.msra.gmra.mrb[0].mxu1 %vm468_vm3, %v3217_v63  ;;  %vm360_vm4 = vcmp.ge.f32.partialorder %v3384_v28, 1.0  ;;  %v2189_v63 = vld [vmem:[%s3741_s2 + $0x398] sm:$0xff]  ;;  %v2099_v39 = vld [vmem:[%s3741_s2 + $0x100] sm:$0xff]  ;;  %v2101_v44 = vld [vmem:[%s3741_s2 + $0x110] sm:$0xff]  ;;  %vm362_vm5 = vcmp.ge.f32.partialorder %v3387_v31, 1.0  ;;  %v2476_v53 = vpack.c.bf16 %v2184_v0, %v2182_v30 }
  0x66   : > { %2393 = vmatpush1.bf16.msra.mxu1 %v2392_v18  ;;  %786 = vmatprep.mubr.f32.mxu1 %v2607_v8  ;;  %vm368_vm6 = vcmp.ge.f32.partialorder %v3389_v23, 1.0  ;;  %vm370_vm7 = vcmp.ge.f32.partialorder %v3391_v24, 1.0  ;;  %v456_v45 = vsel %vm360_vm4, 0.0, %v3384_v28  ;;  %v3435_v46 = vld [vmem:[%s3741_s2 + $0x380] sm:$0xff]  ;;  %v2188_v47 = vld [vmem:[%s3741_s2 + $0x390] sm:$0xff]  ;;  %v458_v51 = vsel %vm362_vm5, 0.0, %v3387_v31 }
  0x67   : > { %2469 = vmatpush1.bf16.msra.mxu0 %v2468_v17  ;;  %2395 = vmatprep.subr.bf16.mxu1 %v2394_v56  ;;  %v464_v32 = vsel %vm368_vm6, 0.0, %v3389_v23  ;;  %v466_v59 = vsel %vm370_vm7, 0.0, %v3391_v24  ;;  %490 = vst.msk [vmem:[#allocation2 + $0xa0] sm:$0xff] %vm468_vm3, %v456_v45  ;;  %492 = vst.msk [vmem:[#allocation2 + $0xb0] sm:$0xff] %vm468_vm3, %v458_v51  ;;  %v2400_v37 = vpack.c.bf16 %v2101_v44, %v2099_v39  ;;  %v275_v43 = vld [vmem:[#allocation2 + $0xf8] sm:$0xf] }
  0x68   : > { %2471 = vmatprep.subr.bf16.mxu0 %v2470_v55  ;;  %498 = vst.msk [vmem:[#allocation2 + $0xe0] sm:$0xff] %vm468_vm3, %v464_v32  ;;  %500 = vst.msk [vmem:[#allocation2 + $0xf0] sm:$0xff] %vm468_vm3, %v466_v59  ;;  %v297_v5 = vld [vmem:[%s3739_s0 + $0xa8] sm:$0xf]  ;;  %v299_v54 = vld [vmem:[%s3739_s0 + $0xb8] sm:$0xf]  ;;  %v2478_v3 = vpack.c.bf16 %v2189_v63, %v2187_v9  ;;  %v2480_v11 = vpack.c.bf16 %v2188_v47, %v3435_v46 }
  0x69   : > { %v305_v48 = vld [vmem:[%s3739_s0 + $0xe8] sm:$0xf]  ;;  %v307_v60 = vld [vmem:[%s3739_s0 + $0xf8] sm:$0xf]  ;;  %v329_v61 = vadd.f32 %v297_v5, %v265_v16  ;;  %v331_v2 = vadd.f32 %v299_v54, %v267_v1  ;;  %v2065_v12 = vsel %vm360_vm4, 1.0, %v2607_v8  ;;  %v2067_v13 = vsel %vm362_vm5, 1.0, %v2607_v8 }
  0x6a   : > { %2397 = vmatpush1.bf16.msra.mxu1 %v2396_v38  ;;  %v337_v4 = vadd.f32 %v305_v48, %v273_v52  ;;  %v339_v10 = vadd.f32 %v307_v60, %v275_v43  ;;  %v2191_v49 = vld [vmem:[%s3741_s2 + $0x3a8] sm:$0xff]  ;;  %v2193_v6 = vld [vmem:[%s3741_s2 + $0x3b8] sm:$0xff]  ;;  %v2073_v14 = vsel %vm368_vm6, 1.0, %v2607_v8  ;;  %v2075_v15 = vsel %vm370_vm7, 1.0, %v2607_v8  ;;  %v2190_v41 = vld [vmem:[%s3741_s2 + $0x3a0] sm:$0xff] }
  0x6b   : > { %2473 = vmatpush1.bf16.msra.mxu0 %v2472_v25  ;;  %2399 = vmatprep.subr.bf16.mxu1 %v2398_v40  ;;  %vm361_vm8 = vcmp.ge.f32.partialorder %v329_v61, 1.0  ;;  %vm363_vm10 = vcmp.ge.f32.partialorder %v331_v2, 1.0  ;;  %v2482_v42 = vpack.c.bf16 %v2193_v6, %v2191_v49  ;;  %v2192_v62 = vld [vmem:[%s3741_s2 + $0x3b0] sm:$0xff]  ;;  %v2196_v17 = vld [vmem:[%s3741_s2 + $0x3c8] sm:$0xff]  ;;  %v2198_v18 = vld [vmem:[%s3741_s2 + $0x3d8] sm:$0xff]  ;;  %v520_v21 = vmax.f32 %v2065_v12, %v2067_v13 }
  0x6c   : > { %2475 = vmatprep.subr.bf16.mxu0 %v2474_v57  ;;  %vm369_vm11 = vcmp.ge.f32.partialorder %v337_v4, 1.0  ;;  %vm371_vm12 = vcmp.ge.f32.partialorder %v339_v10, 1.0  ;;  %v457_v35 = vsel %vm361_vm8, 0.0, %v329_v61  ;;  %v459_v36 = vsel %vm363_vm10, 0.0, %v331_v2  ;;  %v2195_v26 = vld [vmem:[%s3741_s2 + $0x3c0] sm:$0xff]  ;;  %v2197_v27 = vld [vmem:[%s3741_s2 + $0x3d0] sm:$0xff] }
  0x6d   : > { %v465_v19 = vsel %vm369_vm11, 0.0, %v337_v4  ;;  %v467_v20 = vsel %vm371_vm12, 0.0, %v339_v10  ;;  %491 = vst.msk [vmem:[#allocation2 + $0xa8] sm:$0xf] %vm470_vm9, %v457_v35  ;;  %493 = vst.msk [vmem:[#allocation2 + $0xb8] sm:$0xf] %vm470_vm9, %v459_v36  ;;  %v522_v55 = vmax.f32 %v2073_v14, %v2075_v15  ;;  %v2484_v56 = vpack.c.bf16 %v2192_v62, %v2190_v41 }
  0x6e   : > { %2181 = vmatmul.mubr.msk.f32.vlgmr.msra.gmra.mrb[0].mxu0 %vm468_vm3, %v1263_v58  ;;  %2401 = vmatpush1.bf16.msra.mxu1 %v2400_v37  ;;  %499 = vst.msk [vmem:[#allocation2 + $0xe8] sm:$0xf] %vm470_vm9, %v465_v19  ;;  %501 = vst.msk [vmem:[#allocation2 + $0xf8] sm:$0xf] %vm470_vm9, %v467_v20  ;;  %v2486_v22 = vpack.c.bf16 %v2198_v18, %v2196_v17  ;;  %v2066_v28 = vsel %vm361_vm8, 1.0, %v2607_v8  ;;  %v2068_v31 = vsel %vm363_vm10, 1.0, %v2607_v8  ;;  %v1613_v18 = vlaneseq }
  0x6f   : > { %2477 = vmatpush1.bf16.msra.mxu0 %v2476_v53  ;;  %1419 = vmatprep.mubr.f32.mxu0 %v2607_v8  ;;  %v2074_v23 = vsel %vm369_vm11, 1.0, %v2607_v8  ;;  %v2076_v24 = vsel %vm371_vm12, 1.0, %v2607_v8  ;;  %v2200_v25 = vld [vmem:[%s3741_s2 + $0x3e8] sm:$0xff]  ;;  %v2202_v57 = vld [vmem:[%s3741_s2 + $0x3f8] sm:$0xff]  ;;  %v524_v33 = vmax.f32 %v520_v21, %v522_v55  ;;  %v2488_v34 = vpack.c.bf16 %v2197_v27, %v2195_v26  ;;  %v2199_v38 = vld [vmem:[%s3741_s2 + $0x3e0] sm:$0xff] }
  0x70   : > { %2479 = vmatprep.subr.bf16.mxu0 %v2478_v3  ;;  %v521_v29 = vmax.f32 %v2066_v28, %v2068_v31  ;;  %v523_v30 = vmax.f32 %v2074_v23, %v2076_v24  ;;  %v2490_v0 = vpack.c.bf16 %v2202_v57, %v2200_v25  ;;  %v2201_v40 = vld [vmem:[%s3741_s2 + $0x3f0] sm:$0xff]  ;;  %v2204_v9 = vld [vmem:[%s3741_s2 + $0x408] sm:$0xff]  ;;  %v2206_v63 = vld [vmem:[%s3741_s2 + $0x418] sm:$0xff]  ;;  %v2608_v41 = vmov 0.0|0.0  }
  0x71   : > { %2103 = vmatmul.mubr.msk.f32.vlgmr.msra.gmra.mrb[0].mxu1 %vm468_vm3, %v719_v7  ;;  %v2492_v39 = vpack.c.bf16 %v2201_v40, %v2199_v38  ;;  %v2494_v45 = vpack.c.bf16 %v2206_v63, %v2204_v9  ;;  %v2203_v46 = vld [vmem:[%s3741_s2 + $0x400] sm:$0xff]  ;;  %v2205_v47 = vld [vmem:[%s3741_s2 + $0x410] sm:$0xff]  ;;  %v2209_v50 = vld [vmem:[%s3741_s2 + $0x428] sm:$0xff]  ;;  %v1442_v59 = vrot.slane %v524_v33, 2  ;;  %v1533_v6 = vrot.slane %v524_v33, 4  ;;  %2510 = vmatprep.subr.bf16.mxu1 %v2608_v41 }
  0x72   : > { %v525_v44 = vmax.f32 %v521_v29, %v523_v30  ;;  %v2211_v51 = vld [vmem:[%s3741_s2 + $0x438] sm:$0xff]  ;;  %v2496_v32 = vpack.c.bf16 %v2205_v47, %v2203_v46  ;;  %v2208_v52 = vld [vmem:[%s3741_s2 + $0x420] sm:$0xff]  ;;  %v2210_v53 = vld [vmem:[%s3741_s2 + $0x430] sm:$0xff]  ;;  %v1614_v19 = vshrl.u32 %v1613_v18, 7 }
  0x73   : > { %2481 = vmatpush1.bf16.msra.mxu0 %v2480_v11  ;;  %v2498_v1 = vpack.c.bf16 %v2211_v51, %v2209_v50  ;;  %v2213_v37 = vld [vmem:[%s3741_s2 + $0x448] sm:$0xff]  ;;  %v2215_v43 = vld [vmem:[%s3741_s2 + $0x458] sm:$0xff]  ;;  %v2500_v54 = vpack.c.bf16 %v2210_v53, %v2208_v52  ;;  %v2212_v48 = vld [vmem:[%s3741_s2 + $0x440] sm:$0xff] }
  0x74   : > { %2483 = vmatprep.subr.bf16.mxu0 %v2482_v42  ;;  %v1443_v16 = vrot.slane %v525_v44, 2  ;;  %v2502_v58 = vpack.c.bf16 %v2215_v43, %v2213_v37  ;;  %v2214_v60 = vld [vmem:[%s3741_s2 + $0x450] sm:$0xff]  ;;  %v2217_v61 = vld [vmem:[%s3741_s2 + $0x468] sm:$0xff]  ;;  %v2219_v2 = vld [vmem:[%s3741_s2 + $0x478] sm:$0xff]  ;;  %v1534_v7 = vrot.slane %v525_v44, 4  ;;  %v1615_v20 = vsub.s32 0, %v1614_v19 }
  0x75   : > { %v2504_v3 = vpack.c.bf16 %v2214_v60, %v2212_v48  ;;  %v2506_v4 = vpack.c.bf16 %v2219_v2, %v2217_v61  ;;  %v2216_v10 = vld [vmem:[%s3741_s2 + $0x460] sm:$0xff]  ;;  %v2218_v11 = vld [vmem:[%s3741_s2 + $0x470] sm:$0xff]  ;;  %v2224_v14 = vld [vmem:[%s3742_s3 + $0x48] sm:$0xff]  ;;  %v1619_v55 = vsub.s32 1, %v1614_v19 }
  0x76   : > { %v1444_v5 = vsel %vm553_vm13, %v1442_v59, %v1443_v16  ;;  %v2508_v49 = vpack.c.bf16 %v2218_v11, %v2216_v10  ;;  %v1535_v12 = vsel %vm716_vm2, %v1533_v6, %v1534_v7  ;;  %v2223_v13 = vld [vmem:[%s3742_s3 + $0x40] sm:$0xff]  ;;  %v2225_v15 = vld [vmem:[%s3742_s3 + $0x50] sm:$0xff]  ;;  %v2226_v36 = vld [vmem:[%s3742_s3 + $0x58] sm:$0xff]  ;;  %vm1650_vm2 = vcmask 523264  }
  0x77   : > { %2485 = vmatpush1.bf16.msra.mxu0 %v2484_v56  ;;  %v2511_v35 = vpack.c.bf16 %v2224_v14, %v2223_v13  ;;  %v2514_v42 = vpack.c.bf16 %v2226_v36, %v2225_v15  ;;  %v1611_v21 = vld [vmem:[%s3740_s1] sm:$0x3]  ;;  %v2229_v23 = vld [vmem:[%s3742_s3 + $0x70] sm:$0xff]  ;;  %v2230_v24 = vld [vmem:[%s3742_s3 + $0x78] sm:$0xff] }
  0x78   : > { %2487 = vmatprep.subr.bf16.mxu0 %v2486_v22  ;;  %v2227_v56 = vld [vmem:[%s3742_s3 + $0x60] sm:$0xff]  ;;  %v2228_v22 = vld [vmem:[%s3742_s3 + $0x68] sm:$0xff]  ;;  %v1616_v27 = vrot.slane %v1611_v21, %v1615_v20  ;;  %v1620_v31 = vrot.slane %v1611_v21, %v1619_v55  ;;  %v1654_v43 = vld [vmem:[%s3742_s3 + $0x10] sm:$0xff] }
  0x79   : > { %2512 = vmatpush3.bf16.msra.mxu1 %v2511_v35  ;;  %v2517_v26 = vpack.c.bf16 %v2228_v22, %v2227_v56  ;;  %v1652_v16 = vld [vmem:[%s3742_s3] sm:$0xff]  ;;  %v1657_v48 = vld [vmem:[%s3742_s3 + $0x28] sm:$0xff]  ;;  %v1658_v61 = vld [vmem:[%s3742_s3 + $0x30] sm:$0xff] }
  0x7a   : > { %2194 = vmatmul.mubr.msk.f32.vlgmr.msra.gmra.mrb[0].mxu0 %vm468_vm3, %v524_v33  ;;  %2513 = vmatprep.subr.bf16.mxu1 %v2608_v41  ;;  %v2520_v33 = vpack.c.bf16 %v2230_v24, %v2229_v23  ;;  %v1659_v2 = vld [vmem:[%s3742_s3 + $0x38] sm:$0xff]  ;;  %v2234_v10 = vld [vmem:[%s3742_s3 + $0x88] sm:$0xff]  ;;  %v2239_v15 = vld [vmem:[%s3742_s3 + $0xb0] sm:$0xff] }
  0x7b   : > { %2489 = vmatpush1.bf16.msra.mxu0 %v2488_v34  ;;  %1511 = vmatprep.mubr.f32.mxu0 %v2607_v8  ;;  %v1625_v34 = vld [vmem:[#allocation3] sm:$0xff]  ;;  %v2236_v6 = vld [vmem:[%s3742_s3 + $0x98] sm:$0xff]  ;;  %v2238_v13 = vld [vmem:[%s3742_s3 + $0xa8] sm:$0xff] }
  0x7c   : > { %2491 = vmatprep.subr.bf16.mxu0 %v2490_v0  ;;  %v1626_v0 = vld [vmem:[#allocation3 + $0x8] sm:$0xff]  ;;  %v2240_v35 = vld [vmem:[%s3742_s3 + $0xb8] sm:$0xff]  ;;  %v2244_v19 = vld [vmem:[%s3742_s3 + $0xd0] sm:$0xff] }
  0x7d   : > { %2515 = vmatpush3.bf16.msra.mxu1 %v2514_v42  ;;  %v2544_v36 = vpack.c.bf16 %v2240_v35, %v2239_v15  ;;  %v2242_v42 = vld [vmem:[%s3742_s3 + $0xc0] sm:$0xff]  ;;  %v2245_v20 = vld [vmem:[%s3742_s3 + $0xd8] sm:$0xff]  ;;  %v2247_v56 = vld [vmem:[%s3742_s3 + $0xe8] sm:$0xff] }
  0x7e   : > { %2516 = vmatprep.subr.bf16.mxu1 %v2608_v41  ;;  %v2550_v21 = vpack.c.bf16 %v2245_v20, %v2244_v19  ;;  %v2246_v55 = vld [vmem:[%s3742_s3 + $0xe0] sm:$0xff] }
  0x7f   : > { %2493 = vmatpush1.bf16.msra.mxu0 %v2492_v39  ;;  %v2553_v22 = vpack.c.bf16 %v2247_v56, %v2246_v55 }
  0x80   : > { %2495 = vmatprep.subr.bf16.mxu0 %v2494_v45 }
  0x81   : > { %2518 = vmatpush3.bf16.msra.mxu1 %v2517_v26  ;;  %v2248_v26 = vld [vmem:[%s3742_s3 + $0xf0] sm:$0xff] }
  0x82   : > { %2519 = vmatprep.subr.bf16.mxu1 %v2608_v41 }
  0x83   : > { %2497 = vmatpush1.bf16.msra.mxu0 %v2496_v32 }
  0x84   : > { %2499 = vmatprep.subr.bf16.mxu0 %v2498_v1  ;;  %v1653_v1 = vld [vmem:[%s3742_s3 + $0x8] sm:$0xff] }
  0x85   : > { %2521 = vmatpush3.bf16.msra.mxu1 %v2520_v33  ;;  %v2523_v53 = vpack.c.bf16 %v1653_v1, %v1652_v16 }
  0x86   : > { %2207 = vmatmul.mubr.msk.f32.vlgmr.msra.gmra.mrb[0].mxu0 %vm468_vm3, %v1444_v5  ;;  %2522 = vmatprep.subr.bf16.mxu1 %v2608_v41  ;;  %v1655_v5 = vld [vmem:[%s3742_s3 + $0x18] sm:$0xff] }
  0x87   : > { %2501 = vmatpush1.bf16.msra.mxu0 %v2500_v54  ;;  %1602 = vmatprep.mubr.f32.mxu0 %v2607_v8  ;;  %v2526_v54 = vpack.c.bf16 %v1655_v5, %v1654_v43 }
  0x88   : > { %2503 = vmatprep.subr.bf16.mxu0 %v2502_v58  ;;  %v1656_v58 = vld [vmem:[%s3742_s3 + $0x20] sm:$0xff] }
  0x89   : > { %v2529_v60 = vpack.c.bf16 %v1657_v48, %v1656_v58 }
  0x8b   : > { %2505 = vmatpush1.bf16.msra.mxu0 %v2504_v3  ;;  %v2532_v3 = vpack.c.bf16 %v1659_v2, %v1658_v61 }
  0x8c   : > { %2507 = vmatprep.subr.bf16.mxu0 %v2506_v4  ;;  %v2233_v4 = vld [vmem:[%s3742_s3 + $0x80] sm:$0xff] }
  0x8d   : > { %v2535_v11 = vpack.c.bf16 %v2234_v10, %v2233_v4 }
  0x8f   : > { %2509 = vmatpush1.bf16.msra.mxu0 %v2508_v49  ;;  %v2235_v49 = vld [vmem:[%s3742_s3 + $0x90] sm:$0xff] }
  0x90   : > { %v2538_v7 = vpack.c.bf16 %v2236_v6, %v2235_v49 }
  0x92   : > { %2220 = vmatmul.mubr.msk.f32.vlgmr.msra.gmra.mrb[0].mxu0 %vm468_vm3, %v1535_v12  ;;  %vm2609_vm3 = vmmov 0   ;;  %v2237_v12 = vld [vmem:[%s3742_s3 + $0xa0] sm:$0xff] }
  0x93   : > { %2306 = vmatprep.mubr.msk.f32.mxu1 %vm2609_vm3, %v2607_v8  ;;  %v2541_v14 = vpack.c.bf16 %v2238_v13, %v2237_v12 }
 0x144   : > { %v788_v62 = vpop.f32.mrb[0].mxu1 }
 0x145   : > { %v790_v17 = vpop.f32.mrb[1].mxu1 }
 0x165   : > { %v1604_v28 = vpop.f32.mrb[0].mxu0 }
 0x166   : > { %v2558_v25 = vadd.f32 %v1604_v28, %v788_v62  ;;  %v1606_v57 = vpop.f32.mrb[1].mxu0  ;;  %v2243_v62 = vld [vmem:[%s3742_s3 + $0xc8] sm:$0xff] }
 0x167   : > { %v2559_v29 = vadd.f32 %v1606_v57, %v790_v17  ;;  %v2547_v17 = vpack.c.bf16 %v2243_v62, %v2242_v42 }
 0x168   : > { %v1623_v30 = vadd.f32 %v2558_v25, %v1616_v27  ;;  %v2249_v27 = vld [vmem:[%s3742_s3 + $0xf8] sm:$0xff] }
 0x169   : > { %v1624_v38 = vadd.f32 %v2559_v29, %v1620_v31  ;;  %v2556_v28 = vpack.c.bf16 %v2249_v27, %v2248_v26 }
 0x16a   : > { %v1627_v40 = vadd.f32 %v1625_v34, %v1623_v30 }
 0x16b   : > { %v1628_v9 = vadd.f32 %v1626_v0, %v1624_v38  ;;  %v1981_v38 = vld [vmem:[#allocation4] sm:$0x3] }
 0x16c   : > { %vm1629_vm9 = vcmp.ge.f32.partialorder %v1627_v40, 1.0 }
 0x16d   : > { %vm1630_vm13 = vcmp.ge.f32.partialorder %v1628_v9, 1.0  ;;  %v2221_v63 = vsel %vm1629_vm9, 1.0, %v2607_v8  ;;  %v1635_v39 = vsel %vm1629_vm9, 0.0, %v1627_v40 }
 0x16e   : > { %v2222_v44 = vsel %vm1630_vm13, 1.0, %v2607_v8  ;;  %v1636_v45 = vsel %vm1630_vm13, 0.0, %v1628_v9  ;;  %1637 = vst [vmem:[#allocation3] sm:$0xff] %v1635_v39 }
 0x16f   : > { %1638 = vst [vmem:[#allocation3 + $0x8] sm:$0xff] %v1636_v45  ;;  %v2593_v46 = vpack.i.bf16 %v2222_v44, %v2221_v63 }
 0x171   : > { %2594 = vrot.lane.b32.xlu0 %v2593_v46, %s2610_s29 }
 0x1e3   : > { %v2595_v47 = vpop.permute.xlu0 %2594 }
 0x1e4   : > { %v2597_v50 = vunpack.i.h.bf16 %v2595_v47  ;;  %v2596_v51 = vunpack.i.l.bf16 %v2595_v47 }
 0x1e6   : > { %v1648_v32 = vmax.f32 %v2222_v44, %v2597_v50  ;;  %v1643_v59 = vmax.f32 %v2221_v63, %v2596_v51 }
 0x1e8   : > { %v3633_v52 = vmax.f32 %v1643_v59, %v1648_v32 }
 0x1ea   : > { %1651 = vst.msk [vmem:[%s2652_s24] sm:$0xff] %vm1650_vm2, %v3633_v52  ;;  %v1670_v37 = vrot.slane %v3633_v52, 2  ;;  %v1824_v18 = vrot.slane %v3633_v52, 4  ;;  %v1907_v31 = vrot.slane %v3633_v52, 6 }
 0x1ec   : > { %2307 = vmatmul.mubr.msk.f32.vlgmr.msra.gmra.mrb[2].mxu1 %vm1650_vm2, %v1670_v37 }
 0x1ed   : > { %2524 = vmatpush3.bf16.msra.mxu1 %v2523_v53  ;;  %2325 = vmatprep.mubr.msk.f32.mxu1 %vm2609_vm3, %v2607_v8 }
 0x1ee   : > { %2525 = vmatprep.subr.bf16.mxu1 %v2608_v41 }
 0x1f1   : > { %2527 = vmatpush3.bf16.msra.mxu1 %v2526_v54 }
 0x1f2   : > { %2528 = vmatprep.subr.bf16.mxu1 %v2608_v41 }
 0x1f5   : > { %2530 = vmatpush3.bf16.msra.mxu1 %v2529_v60 }
 0x1f6   : > { %2531 = vmatprep.subr.bf16.mxu1 %v2608_v41 }
 0x1f9   : > { %2533 = vmatpush3.bf16.msra.mxu1 %v2532_v3 }
 0x1fa   : > { %2534 = vmatprep.subr.bf16.mxu1 %v2608_v41 }
 0x1fc   : > { %2326 = vmatmul.mubr.msk.f32.vlgmr.msra.gmra.mrb[4].mxu1 %vm1650_vm2, %v3633_v52 }
 0x1fd   : > { %2536 = vmatpush3.bf16.msra.mxu1 %v2535_v11  ;;  %2344 = vmatprep.mubr.msk.f32.mxu1 %vm2609_vm3, %v2607_v8 }
 0x1fe   : > { %2537 = vmatprep.subr.bf16.mxu1 %v2608_v41 }
 0x201   : > { %2539 = vmatpush3.bf16.msra.mxu1 %v2538_v7 }
 0x202   : > { %2540 = vmatprep.subr.bf16.mxu1 %v2608_v41 }
 0x205   : > { %2542 = vmatpush3.bf16.msra.mxu1 %v2541_v14 }
 0x206   : > { %2543 = vmatprep.subr.bf16.mxu1 %v2608_v41 }
 0x209   : > { %2545 = vmatpush3.bf16.msra.mxu1 %v2544_v36 }
 0x20a   : > { %2546 = vmatprep.subr.bf16.mxu1 %v2608_v41 }
 0x20c   : > { %2345 = vmatmul.mubr.msk.f32.vlgmr.msra.gmra.mrb[6].mxu1 %vm1650_vm2, %v1824_v18 }
 0x20d   : > { %2548 = vmatpush3.bf16.msra.mxu1 %v2547_v17  ;;  %2363 = vmatprep.mubr.msk.f32.mxu1 %vm2609_vm3, %v2607_v8 }
 0x20e   : > { %2549 = vmatprep.subr.bf16.mxu1 %v2608_v41 }
 0x211   : > { %2551 = vmatpush3.bf16.msra.mxu1 %v2550_v21 }
 0x212   : > { %2552 = vmatprep.subr.bf16.mxu1 %v2608_v41 }
 0x215   : > { %2554 = vmatpush3.bf16.msra.mxu1 %v2553_v22 }
 0x216   : > { %2555 = vmatprep.subr.bf16.mxu1 %v2608_v41  ;;  %v1987_v41 = vld [vmem:[%s3743_s4] sm:$0x3] }
 0x219   : > { %2557 = vmatpush3.bf16.msra.mxu1 %v2556_v28 }
 0x21c   : > { %2364 = vmatmul.mubr.msk.f32.vlgmr.msra.gmra.mrb[8].mxu1 %vm1650_vm2, %v1907_v31 }
 0x2bf   : > { %v1739_v23 = vpop.f32.mrb[2].mxu1 }
 0x2c0   : > { %v2308_v24 = vpop.f32.mrb[3].mxu1 }
 0x2cf   : > { %v1811_v25 = vpop.f32.mrb[4].mxu1 }
 0x2d0   : > { %v1812_v57 = vadd.f32 %v1811_v25, %v1739_v23  ;;  %v2327_v33 = vpop.f32.mrb[5].mxu1 }
 0x2df   : > { %v1893_v34 = vpop.f32.mrb[6].mxu1 }
 0x2e0   : > { %v1897_v29 = vadd.f32 %v1893_v34, %v1812_v57  ;;  %v2346_v30 = vpop.f32.mrb[7].mxu1 }
 0x2ef   : > { %v1976_v0 = vpop.f32.mrb[8].mxu1 }
 0x2f0   : > { %v1980_v40 = vadd.f32 %v1976_v0, %v1897_v29  ;;  %v2365_v9 = vpop.f32.mrb[9].mxu1 }
 0x2f2   : > { %v1982_v63 = vadd.f32 %v1981_v38, %v1980_v40 }
 0x2f4   : > { %vm1983_vm15 = vcmp.ge.f32.partialorder %v1982_v63, 1.0 }
 0x2f5   : > { %v1984_v39 = vsel %vm1983_vm15, 0.0, %v1982_v63  ;;  %v2251_v44 = vsel %vm1983_vm15, 1.0, %v2607_v8 }
 0x2f6   : > { %1986 = vst.msk [vmem:[#allocation4] sm:$0x3] %vm1985_vm14, %v1984_v39  ;;  %v1990_v45 = vadd.f32 %v2251_v44, %v1987_v41 }
 0x2f8   : > { %1991 = vst.msk [vmem:[%s3743_s4] sm:$0x3] %vm1985_vm14, %v1990_v45 }
 0x2f9 PF: > { %s16_s18 = sadd.s32 1, %s2604_s18  }
 0x2fa   : > { %p13_p5 = scmp.ge.s32.totalorder %s16_s18, 6  }
 0x2fc   :  { %15 = sbr.rel (!%p13_p5) target bundleno = 1 (0x1), region = 89 }

</bundles_post_ra>
